<compile_context>
chip_gen: v7x
topology: tpu7x:2x2x1
jax: 0.10.0
libtpu: 0.0.40
codegen_flags: <defaults>
</compile_context>

<pallas_src>
import functools

import jax
import jax.numpy as jnp
from jax.experimental import pallas as pl
from jax.experimental.pallas import tpu as pltpu

IN_DIM = 3                     # use_color=False -> init_dim = 3
HIDDEN = 256
OUT_DIM = 64
LAN_IN = 512
LAN_OUT = 32
PDF_DIM = OUT_DIM + LAN_OUT    # 96
OUT_PAD = 128                  # lane-dense store width (cols 96:128 are zeros)

_VMEM_LIMIT = 32 * 1024 * 1024


def _round_up(x, m):
    return (x + m - 1) // m * m


# ---------------------------------------------------------------------------
# kernel 1: fc1-3 of the tile's branch, spill h (bf16), masked global max
# ---------------------------------------------------------------------------
def _reduce_kernel(br_ref, x_ref, m_ref, w1_ref, b1_ref, w2_ref, b2_ref,
                   w3_ref, b3_ref, h_ref, g_ref):
    i = pl.program_id(0)
    br = br_ref[i]                                          # this tile's branch

    @pl.when(i == 0)
    def _():
        # (2,1,H) output block has a constant index map -> stays VMEM-resident
        # across the whole ("arbitrary") grid and acts as the accumulator.
        g_ref[...] = jnp.full(g_ref.shape, -jnp.inf, jnp.float32)

    x = x_ref[...]                                          # (T, 3)  f32
    w1 = w1_ref[0]                                          # (3, H)  f32
    # fc1: K=3 contraction -> 3 broadcast FMAs on the VPU (keeps the MXU free)
    h = (x[:, 0:1] * w1[0:1, :] + x[:, 1:2] * w1[1:2, :]
         + x[:, 2:3] * w1[2:3, :] + b1_ref[0])
    h = jnp.maximum(h, 0.0)
    # fc2 / fc3: bf16 operands on the MXU, f32 accumulation, f32 bias + ReLU
    h = jnp.maximum(
        jnp.dot(h.astype(jnp.bfloat16), w2_ref[0],
                preferred_element_type=jnp.float32) + b2_ref[0], 0.0)
    h = jnp.maximum(
        jnp.dot(h.astype(jnp.bfloat16), w3_ref[0],
                preferred_element_type=jnp.float32) + b3_ref[0], 0.0)

    h_ref[...] = h.astype(jnp.bfloat16)                     # spill for decode

    # masked per-tile max; padding / other-group rows (smask != br) -> -inf
    hm = jnp.where(m_ref[...] == br, h, -jnp.inf)
    tm = jnp.max(hm, axis=0, keepdims=True)                 # (1, H)
    g0 = g_ref[0]
    g1 = g_ref[1]
    g_ref[0] = jnp.where(br == 0, jnp.maximum(g0, tm), g0)
    g_ref[1] = jnp.where(br == 1, jnp.maximum(g1, tm), g1)
    # TODO(synk): on v7x the reduce pass could shard over both TensorCores
    # (leading size-2 "parallel" axis + per-core partial maxima merged in XLA);
    # kept single-core here since it cannot be validated on v5e/v6e.


# ---------------------------------------------------------------------------
# kernel 2: fc4 (g@w4g+b4 pre-folded) + widened fc5 -> lane-dense (T,128) tile
# ---------------------------------------------------------------------------
def _decode_kernel(br_ref, h_ref, w4h_ref, gf_ref, w5_ref, b5_ref, out_ref):
    del br_ref                                              # used by index_maps
    h = h_ref[...]                                          # (T, H) bf16
    h4 = jnp.maximum(
        jnp.dot(h, w4h_ref[0], preferred_element_type=jnp.float32) + gf_ref[0],
        0.0)                                                # (T, H) f32
    # w5 is widened to 128 cols (cols 64:127 zero) and b5 carries [b5|lan|0],
    # so this single matmul yields the fused [pdf | lan | 0] output tile.
    out_ref[...] = (jnp.dot(h4.astype(jnp.bfloat16), w5_ref[0],
                            preferred_element_type=jnp.float32) + b5_ref[0])


# ---------------------------------------------------------------------------
# wrappers
# ---------------------------------------------------------------------------
def _branch_spec(block_tail):
    """Weight BlockSpec whose leading axis is selected by the tile's branch."""
    nd = len(block_tail)
    return pl.BlockSpec((1,) + tuple(block_tail),
                        lambda i, br, _nd=nd: (br[i],) + (0,) * _nd)


def _mlpg_grouped(p0, mask_i, lan, params, tile):
    n = p0.shape[0]
    n_work = _round_up(n, tile) + tile        # worst-case: both groups padded
    num_tiles = n_work // tile

    # --- group partition (tiny XLA prologue) -------------------------------
    is0 = (mask_i == 0)
    i0 = is0.astype(jnp.int32)
    i1 = 1 - i0
    rank0 = jnp.cumsum(i0) - i0                               # exclusive ranks
    rank1 = jnp.cumsum(i1) - i1
    c0 = jnp.sum(i0)
    c0_pad = ((c0 + tile - 1) // tile) * tile                 # group-0 region
    dest = jnp.where(is0, rank0, c0_pad + rank1)              # (n,) positions
    src = jnp.zeros((n_work,), jnp.int32).at[dest].set(
        jnp.arange(n, dtype=jnp.int32))
    smask = jnp.full((n_work,), 2, jnp.int32).at[dest].set(
        mask_i).reshape(n_work, 1)                            # 2 = padding row
    x_sorted = p0.astype(jnp.float32)[src]                    # (n_work, 3)
    tile_branch = (jnp.arange(num_tiles, dtype=jnp.int32) * tile
                   >= c0_pad).astype(jnp.int32)               # (num_tiles,)

    # --- pass 1: fc1-3 + h spill + per-branch masked global max ------------
    x_spec = pl.BlockSpec((tile, IN_DIM), lambda i, br: (i, 0))
    m_spec = pl.BlockSpec((tile, 1), lambda i, br: (i, 0))
    h_spec = pl.BlockSpec((tile, HIDDEN), lambda i, br: (i, 0))
    g_spec = pl.BlockSpec((2, 1, HIDDEN), lambda i, br: (0, 0, 0))

    w123 = (params["w1"], params["b1"], params["w2"], params["b2"],
            params["w3"], params["b3"])
    w123_specs = [_branch_spec(w.shape[1:]) for w in w123]

    h_sorted, g = pl.pallas_call(
        _reduce_kernel,
        grid_spec=pltpu.PrefetchScalarGridSpec(
            num_scalar_prefetch=1,
            grid=(num_tiles,),
            in_specs=[x_spec, m_spec] + w123_specs,
            out_specs=(h_spec, g_spec)),
        out_shape=(jax.ShapeDtypeStruct((n_work, HIDDEN), jnp.bfloat16),
                   jax.ShapeDtypeStruct((2, 1, HIDDEN), jnp.float32)),
        compiler_params=pltpu.CompilerParams(
            dimension_semantics=("arbitrary",),
            vmem_limit_bytes=_VMEM_LIMIT),
    )(tile_branch, x_sorted, smask, *w123)

    # --- hoisted global-feature matvec + fc5 widening (plain XLA, tiny) ----
    gfused = jnp.einsum("boh,bhk->bok", g.astype(jnp.bfloat16), params["w4g"],
                        preferred_element_type=jnp.float32) + params["b4"]
    w5 = params["w5"]                                          # (2,H,64) bf16
    w5_wide = jnp.concatenate(
        [w5, jnp.zeros((2, HIDDEN, OUT_PAD - OUT_DIM), w5.dtype)], axis=-1)
    lan_b = jnp.broadcast_to(lan.reshape(1, 1, LAN_OUT),
                             (2, 1, LAN_OUT)).astype(jnp.float32)
    b5_wide = jnp.concatenate(
        [params["b5"], lan_b,
         jnp.zeros((2, 1, OUT_PAD - PDF_DIM), jnp.float32)], axis=-1)

    # --- pass 2: fc4/fc5 decode, lane-dense (tile,128) stores ---------------
    pdf_sorted = pl.pallas_call(
        _decode_kernel,
        grid_spec=pltpu.PrefetchScalarGridSpec(
            num_scalar_prefetch=1,
            grid=(num_tiles,),
            in_specs=[h_spec,
                      _branch_spec((HIDDEN, HIDDEN)),     # w4h
                      _branch_spec((1, HIDDEN)),          # gfused (= g@w4g+b4)
                      _branch_spec((HIDDEN, OUT_PAD)),    # w5 widened
                      _branch_spec((1, OUT_PAD))],        # b5 | lan | 0
            out_specs=pl.BlockSpec((tile, OUT_PAD), lambda i, br: (i, 0))),
        out_shape=jax.ShapeDtypeStruct((n_work, OUT_PAD), jnp.float32),
        compiler_params=pltpu.CompilerParams(
            dimension_semantics=("parallel",),
            vmem_limit_bytes=_VMEM_LIMIT),
    )(tile_branch, h_sorted, w4h := params["w4h"], gfused, w5_wide, b5_wide)

    return pdf_sorted, dest


@functools.partial(jax.jit, static_argnames=("tile_n",))
def mlppvcnn_forward(x_input, p0, t, mask, lan_emd, p0_color, params, *,
                     tile_n=2048):
    """Returns (out, pdf).  pdf is (N, 96) f32.

    tile_n: rows per grid step.  2048 (default) fits the 32 MiB scoped VMEM
    limit on every generation (incl. v7x's 64 MiB physical VMEM); v5e/v6e can
    go 4096 with a ~64 MiB limit if desired.
    """
    n = p0.shape[0]
    tile = min(_round_up(tile_n, 16), _round_up(n, 16))

    mask_i = mask.astype(jnp.int32)
    # lan_proj: (1,512)@(512,32) matvec — plain XLA; a pallas_call's fixed cost
    # would dominate it.
    lan = lan_emd.astype(jnp.float32) @ params["lan_w"] + params["lan_b"]  # (1,32)

    pdf_sorted, dest = _mlpg_grouped(p0, mask_i, lan, params, tile)

    # Un-partition: one fused gather + invalid-row fix-up + 96-col slice.
    # Rows with mask not in {0,1} get zeros in cols 0:63 and lan in 64:95,
    # exactly like torch's zeros-init pdf buffer.
    valid = (mask_i == 0) | (mask_i == 1)
    fill = jnp.concatenate(
        [jnp.zeros((1, OUT_DIM), jnp.float32), lan,
         jnp.zeros((1, OUT_PAD - PDF_DIM), jnp.float32)], axis=-1)
    pdf = jnp.where(valid[:, None], pdf_sorted[dest], fill)[:, :PDF_DIM]

    # TODO(synk): PVCNN2Base source not provided; the PVCNN2 set-abstraction /
    # voxel-conv / attention forward producing `out` is not translated.
    out = None
    return out, pdf


# ---------------------------------------------------------------------------
# parameters (torch nn.Linear shapes, transposed so kernels compute x @ W + b;
# the two branches a/b are stacked on a leading axis of size 2)
# ---------------------------------------------------------------------------
def make_params(key):
    ks = jax.random.split(key, 12)
    s = 0.05
    rnd = lambda k, shape: jax.random.normal(k, shape, jnp.float32) * s
    bf = lambda a: a.astype(jnp.bfloat16)
    w4 = rnd(ks[6], (2, 2 * HIDDEN, HIDDEN))    # fc4 acts on concat([h, g])
    return {
        "w1": rnd(ks[0], (2, IN_DIM, HIDDEN)),           # f32 (VPU FMA path)
        "b1": rnd(ks[1], (2, 1, HIDDEN)),
        "w2": bf(rnd(ks[2], (2, HIDDEN, HIDDEN))),
        "b2": rnd(ks[3], (2, 1, HIDDEN)),
        "w3": bf(rnd(ks[4], (2, HIDDEN, HIDDEN))),
        "b3": rnd(ks[5], (2, 1, HIDDEN)),
        "w4h": bf(w4[:, :HIDDEN, :]),                    # per-point half of fc4
        "w4g": bf(w4[:, HIDDEN:, :]),                    # global-max half of fc4
        "b4": rnd(ks[7], (2, 1, HIDDEN)),
        "w5": bf(rnd(ks[8], (2, HIDDEN, OUT_DIM))),
        "b5": rnd(ks[9], (2, 1, OUT_DIM)),
        "lan_w": rnd(ks[10], (LAN_IN, LAN_OUT)),
        "lan_b": rnd(ks[11], (1, LAN_OUT)),
    }


# ---------------------------------------------------------------------------
# pure-JAX reference (same math + same bf16/f32 precision as the kernels)
# ---------------------------------------------------------------------------
def _mlpg_ref(x, mask2d, p, br, mask_val):
    f32 = jnp.float32
    h = jnp.maximum(x @ p["w1"][br] + p["b1"][br], 0.0)
    h = jnp.maximum(jnp.dot(h.astype(jnp.bfloat16), p["w2"][br],
                            preferred_element_type=f32) + p["b2"][br], 0.0)
    h = jnp.maximum(jnp.dot(h.astype(jnp.bfloat16), p["w3"][br],
                            preferred_element_type=f32) + p["b3"][br], 0.0)
    g = jnp.max(jnp.where(mask2d == mask_val, h, -jnp.inf), axis=0, keepdims=True)
    gfused = jnp.dot(g.astype(jnp.bfloat16), p["w4g"][br],
                     preferred_element_type=f32) + p["b4"][br]
    h4 = jnp.maximum(jnp.dot(h.astype(jnp.bfloat16), p["w4h"][br],
                             preferred_element_type=f32) + gfused, 0.0)
    return jnp.dot(h4.astype(jnp.bfloat16), p["w5"][br],
                   preferred_element_type=f32) + p["b5"][br]


def _forward_ref(p0, mask, lan_emd, params):
    n = p0.shape[0]
    m2 = mask.astype(jnp.int32).reshape(n, 1)
    a = _mlpg_ref(p0, m2, params, 0, 0)
    b = _mlpg_ref(p0, m2, params, 1, 1)
    pdf = jnp.where(m2 == 0, a, jnp.where(m2 == 1, b, 0.0))
    lan = lan_emd @ params["lan_w"] + params["lan_b"]
    return jnp.concatenate([pdf, jnp.broadcast_to(lan, (n, LAN_OUT))], axis=-1)


if __name__ == "__main__":
    key = jax.random.PRNGKey(0)
    kp, kx, kp0, kc, km, kl = jax.random.split(key, 6)

    N = 300                       # not a tile multiple -> exercises padding
    params = make_params(kp)

    x_input = jax.random.normal(kx, (N, 7), jnp.float32)     # PVCNN2 branch only
    p0 = jax.random.normal(kp0, (N, 3), jnp.float32)
    p0_color = jax.random.normal(kc, (N, 3), jnp.float32)    # unused (use_color=False)
    t = jnp.zeros((1,), jnp.float32)
    lan_emd = jax.random.normal(kl, (1, LAN_IN), jnp.float32)

    def run_check(m):
        _, pdf = mlppvcnn_forward(x_input, p0, t, m, lan_emd, p0_color, params,
                                  tile_n=128)                # 4 work tiles
        pdf = jax.block_until_ready(pdf)
        ref = _forward_ref(p0, m, lan_emd, params)
        assert pdf.shape == (N, PDF_DIM)
        err = float(jnp.max(jnp.abs(pdf - ref)))
        assert jnp.allclose(pdf, ref, atol=2e-3, rtol=2e-3), err

    # balanced groups (multiple tiles per branch + per-branch padding)
    mask_bal = (jax.random.uniform(km, (N,)) > 0.5).astype(jnp.int32)
    run_check(mask_bal)
    # highly skewed groups (branch 1 has one nearly-empty tile)
    run_check(jnp.zeros((N,), jnp.int32).at[:5].set(1))
    # empty branch 1 (checks -inf / NaN containment of the unused branch)
    run_check(jnp.zeros((N,), jnp.int32))

    print("KERNEL_OK")
</pallas_src>

<mosaic_0001>
module attributes {stable_mosaic.version = 11 : i64} {
  func.func @_reduce_kernel(%arg0: i32, %arg1: memref<4xi32, #tpu.memory_space<smem>>, %arg2: memref<128x3xf32, #tpu.memory_space<vmem>>, %arg3: memref<128x1xi32, #tpu.memory_space<vmem>>, %arg4: memref<1x3x256xf32, #tpu.memory_space<vmem>>, %arg5: memref<1x1x256xf32, #tpu.memory_space<vmem>>, %arg6: memref<1x256x256xbf16, #tpu.memory_space<vmem>>, %arg7: memref<1x1x256xf32, #tpu.memory_space<vmem>>, %arg8: memref<1x256x256xbf16, #tpu.memory_space<vmem>>, %arg9: memref<1x1x256xf32, #tpu.memory_space<vmem>>, %arg10: memref<128x256xbf16, #tpu.memory_space<vmem>>, %arg11: memref<2x1x256xf32, #tpu.memory_space<vmem>>) attributes {dimension_semantics = [#tpu.dimension_semantics<arbitrary>], iteration_bounds = array<i64: 4>, scalar_prefetch = 1 : i64, scratch_operands = 0 : i64, tpu.core_type = #tpu.core_type<tc>, window_params = [{transform_indices = @transform_0, window_bounds = array<i64: 128, 3>}, {transform_indices = @transform_1, window_bounds = array<i64: 128, 1>}, {transform_indices = @transform_2, window_bounds = array<i64: 1, 3, 256>}, {transform_indices = @transform_3, window_bounds = array<i64: 1, 1, 256>}, {transform_indices = @transform_4, window_bounds = array<i64: 1, 256, 256>}, {transform_indices = @transform_5, window_bounds = array<i64: 1, 1, 256>}, {transform_indices = @transform_6, window_bounds = array<i64: 1, 256, 256>}, {transform_indices = @transform_7, window_bounds = array<i64: 1, 1, 256>}, {transform_indices = @transform_8, window_bounds = array<i64: 128, 256>}, {pipeline_mode = #tpu.pipeline_mode<synchronous>, transform_indices = @transform_9, window_bounds = array<i64: 2, 1, 256>}]} {
    %0 = arith.index_cast %arg0 : i32 to index
    %1 = memref.load %arg1[%0] : memref<4xi32, #tpu.memory_space<smem>>
    %c0_i32 = arith.constant 0 : i32
    %2 = arith.cmpi eq, %arg0, %c0_i32 : i32
    %3 = arith.extui %2 : i1 to i32
    %c0_i32_0 = arith.constant 0 : i32
    %4 = arith.cmpi ne, %3, %c0_i32_0 : i32
    scf.if %4 {
      %cst_42 = arith.constant 0xFF800000 : f32
      %78 = vector.broadcast %cst_42 : f32 to vector<2x1x256xf32>
      %c0_43 = arith.constant 0 : index
      %c0_44 = arith.constant 0 : index
      %c0_45 = arith.constant 0 : index
      %79 = vector.load %arg11[%c0_43, %c0_44, %c0_45] : memref<2x1x256xf32, #tpu.memory_space<vmem>>, vector<2x1x256xf32>
      tpu.vector_store %arg11[%c0_43, %c0_44, %c0_45], %78 {strides = array<i32>} : memref<2x1x256xf32, #tpu.memory_space<vmem>>, vector<2x1x256xf32>,
    } else {
    }
    %c0 = arith.constant 0 : index
    %c0_1 = arith.constant 0 : index
    %5 = vector.load %arg2[%c0, %c0_1] : memref<128x3xf32, #tpu.memory_space<vmem>>, vector<128x3xf32>
    %c0_2 = arith.constant 0 : index
    %c0_3 = arith.constant 0 : index
    %c0_4 = arith.constant 0 : index
    %6 = vector.load %arg4[%c0_2, %c0_3, %c0_4] : memref<1x3x256xf32, #tpu.memory_space<vmem>>, vector<1x3x256xf32>
    %7 = vector.shape_cast %6 : vector<1x3x256xf32> to vector<3x256xf32>
    %8 = vector.extract_strided_slice %5 {offsets = [0, 0], sizes = [128, 1], strides = [1, 1]} : vector<128x3xf32> to vector<128x1xf32>
    %9 = vector.extract_strided_slice %7 {offsets = [0, 0], sizes = [1, 256], strides = [1, 1]} : vector<3x256xf32> to vector<1x256xf32>
    %10 = vector.broadcast %8 : vector<128x1xf32> to vector<128x256xf32>
    %11 = vector.broadcast %9 : vector<1x256xf32> to vector<128x256xf32>
    %12 = arith.mulf %10, %11 : vector<128x256xf32>
    %13 = vector.extract_strided_slice %5 {offsets = [0, 1], sizes = [128, 1], strides = [1, 1]} : vector<128x3xf32> to vector<128x1xf32>
    %14 = vector.extract_strided_slice %7 {offsets = [1, 0], sizes = [1, 256], strides = [1, 1]} : vector<3x256xf32> to vector<1x256xf32>
    %15 = vector.broadcast %13 : vector<128x1xf32> to vector<128x256xf32>
    %16 = vector.broadcast %14 : vector<1x256xf32> to vector<128x256xf32>
    %17 = arith.mulf %15, %16 : vector<128x256xf32>
    %18 = arith.addf %12, %17 : vector<128x256xf32>
    %19 = vector.extract_strided_slice %5 {offsets = [0, 2], sizes = [128, 1], strides = [1, 1]} : vector<128x3xf32> to vector<128x1xf32>
    %20 = vector.extract_strided_slice %7 {offsets = [2, 0], sizes = [1, 256], strides = [1, 1]} : vector<3x256xf32> to vector<1x256xf32>
    %21 = vector.broadcast %19 : vector<128x1xf32> to vector<128x256xf32>
    %22 = vector.broadcast %20 : vector<1x256xf32> to vector<128x256xf32>
    %23 = arith.mulf %21, %22 : vector<128x256xf32>
    %24 = arith.addf %18, %23 : vector<128x256xf32>
    %c0_5 = arith.constant 0 : index
    %c0_6 = arith.constant 0 : index
    %c0_7 = arith.constant 0 : index
    %25 = vector.load %arg5[%c0_5, %c0_6, %c0_7] : memref<1x1x256xf32, #tpu.memory_space<vmem>>, vector<1x1x256xf32>
    %26 = vector.shape_cast %25 : vector<1x1x256xf32> to vector<1x256xf32>
    %27 = vector.broadcast %26 : vector<1x256xf32> to vector<128x256xf32>
    %28 = arith.addf %24, %27 : vector<128x256xf32>
    %cst = arith.constant 0.000000e+00 : f32
    %29 = vector.broadcast %cst : f32 to vector<128x256xf32>
    %30 = arith.maximumf %28, %29 : vector<128x256xf32>
    %31 = arith.truncf %30 : vector<128x256xf32> to vector<128x256xbf16>
    %c0_8 = arith.constant 0 : index
    %c0_9 = arith.constant 0 : index
    %c0_10 = arith.constant 0 : index
    %32 = vector.load %arg6[%c0_8, %c0_9, %c0_10] : memref<1x256x256xbf16, #tpu.memory_space<vmem>>, vector<1x256x256xbf16>
    %33 = vector.shape_cast %32 : vector<1x256x256xbf16> to vector<256x256xbf16>
    %cst_11 = arith.constant dense<0.000000e+00> : vector<128x256xf32>
    %34 = tpu.matmul %31, %33, %cst_11 {dimension_numbers = #tpu.dot_dimension_numbers<[1], [0], [0], [1], [0, 0, 1, 1], [], []>} : vector<128x256xbf16>, vector<256x256xbf16>, vector<128x256xf32> -> vector<128x256xf32>
    %c0_12 = arith.constant 0 : index
    %c0_13 = arith.constant 0 : index
    %c0_14 = arith.constant 0 : index
    %35 = vector.load %arg7[%c0_12, %c0_13, %c0_14] : memref<1x1x256xf32, #tpu.memory_space<vmem>>, vector<1x1x256xf32>
    %36 = vector.shape_cast %35 : vector<1x1x256xf32> to vector<1x256xf32>
    %37 = vector.broadcast %36 : vector<1x256xf32> to vector<128x256xf32>
    %38 = arith.addf %34, %37 : vector<128x256xf32>
    %cst_15 = arith.constant 0.000000e+00 : f32
    %39 = vector.broadcast %cst_15 : f32 to vector<128x256xf32>
    %40 = arith.maximumf %38, %39 : vector<128x256xf32>
    %41 = arith.truncf %40 : vector<128x256xf32> to vector<128x256xbf16>
    %c0_16 = arith.constant 0 : index
    %c0_17 = arith.constant 0 : index
    %c0_18 = arith.constant 0 : index
    %42 = vector.load %arg8[%c0_16, %c0_17, %c0_18] : memref<1x256x256xbf16, #tpu.memory_space<vmem>>, vector<1x256x256xbf16>
    %43 = vector.shape_cast %42 : vector<1x256x256xbf16> to vector<256x256xbf16>
    %cst_19 = arith.constant dense<0.000000e+00> : vector<128x256xf32>
    %44 = tpu.matmul %41, %43, %cst_19 {dimension_numbers = #tpu.dot_dimension_numbers<[1], [0], [0], [1], [0, 0, 1, 1], [], []>} : vector<128x256xbf16>, vector<256x256xbf16>, vector<128x256xf32> -> vector<128x256xf32>
    %c0_20 = arith.constant 0 : index
    %c0_21 = arith.constant 0 : index
    %c0_22 = arith.constant 0 : index
    %45 = vector.load %arg9[%c0_20, %c0_21, %c0_22] : memref<1x1x256xf32, #tpu.memory_space<vmem>>, vector<1x1x256xf32>
    %46 = vector.shape_cast %45 : vector<1x1x256xf32> to vector<1x256xf32>
    %47 = vector.broadcast %46 : vector<1x256xf32> to vector<128x256xf32>
    %48 = arith.addf %44, %47 : vector<128x256xf32>
    %cst_23 = arith.constant 0.000000e+00 : f32
    %49 = vector.broadcast %cst_23 : f32 to vector<128x256xf32>
    %50 = arith.maximumf %48, %49 : vector<128x256xf32>
    %51 = arith.truncf %50 : vector<128x256xf32> to vector<128x256xbf16>
    %c0_24 = arith.constant 0 : index
    %c0_25 = arith.constant 0 : index
    %52 = vector.load %arg10[%c0_24, %c0_25] : memref<128x256xbf16, #tpu.memory_space<vmem>>, vector<128x256xbf16>
    tpu.vector_store %arg10[%c0_24, %c0_25], %51 {strides = array<i32>} : memref<128x256xbf16, #tpu.memory_space<vmem>>, vector<128x256xbf16>,
    %c0_26 = arith.constant 0 : index
    %c0_27 = arith.constant 0 : index
    %53 = vector.load %arg3[%c0_26, %c0_27] : memref<128x1xi32, #tpu.memory_space<vmem>>, vector<128x1xi32>
    %54 = vector.broadcast %1 : i32 to vector<128x1xi32>
    %55 = arith.cmpi eq, %53, %54 : vector<128x1xi32>
    %cst_28 = arith.constant 0xFF800000 : f32
    %56 = vector.shape_cast %55 : vector<128x1xi1> to vector<128x1xi1>
    %57 = vector.broadcast %56 : vector<128x1xi1> to vector<128x256xi1>
    %58 = vector.broadcast %cst_28 : f32 to vector<128x256xf32>
    %59 = arith.select %57, %50, %58 : vector<128x256xi1>, vector<128x256xf32>
    %cst_29 = arith.constant dense<0xFF800000> : vector<256xf32>
    %60 = vector.multi_reduction <maximumf>, %59, %cst_29 [0] : vector<128x256xf32> to vector<256xf32>
    %61 = vector.shape_cast %60 : vector<256xf32> to vector<1x256xf32>
    %c0_30 = arith.constant 0 : index
    %c0_31 = arith.constant 0 : index
    %c0_32 = arith.constant 0 : index
    %62 = vector.load %arg11[%c0_30, %c0_31, %c0_32] : memref<2x1x256xf32, #tpu.memory_space<vmem>>, vector<1x1x256xf32>
    %63 = vector.shape_cast %62 : vector<1x1x256xf32> to vector<1x256xf32>
    %c1 = arith.constant 1 : index
    %c0_33 = arith.constant 0 : index
    %c0_34 = arith.constant 0 : index
    %64 = vector.load %arg11[%c1, %c0_33, %c0_34] : memref<2x1x256xf32, #tpu.memory_space<vmem>>, vector<1x1x256xf32>
    %65 = vector.shape_cast %64 : vector<1x1x256xf32> to vector<1x256xf32>
    %c0_i32_35 = arith.constant 0 : i32
    %66 = arith.cmpi eq, %1, %c0_i32_35 : i32
    %67 = arith.maximumf %63, %61 : vector<1x256xf32>
    %68 = arith.select %66, %67, %63 : vector<1x256xf32>
    %c0_36 = arith.constant 0 : index
    %c0_37 = arith.constant 0 : index
    %c0_38 = arith.constant 0 : index
    %69 = vector.load %arg11[%c0_36, %c0_37, %c0_38] : memref<2x1x256xf32, #tpu.memory_space<vmem>>, vector<1x1x256xf32>
    %70 = vector.shape_cast %69 : vector<1x1x256xf32> to vector<1x256xf32>
    %71 = vector.shape_cast %68 : vector<1x256xf32> to vector<1x1x256xf32>
    tpu.vector_store %arg11[%c0_36, %c0_37, %c0_38], %71 {strides = array<i32>} : memref<2x1x256xf32, #tpu.memory_space<vmem>>, vector<1x1x256xf32>,
    %c1_i32 = arith.constant 1 : i32
    %72 = arith.cmpi eq, %1, %c1_i32 : i32
    %73 = arith.maximumf %65, %61 : vector<1x256xf32>
    %74 = arith.select %72, %73, %65 : vector<1x256xf32>
    %c1_39 = arith.constant 1 : index
    %c0_40 = arith.constant 0 : index
    %c0_41 = arith.constant 0 : index
    %75 = vector.load %arg11[%c1_39, %c0_40, %c0_41] : memref<2x1x256xf32, #tpu.memory_space<vmem>>, vector<1x1x256xf32>
    %76 = vector.shape_cast %75 : vector<1x1x256xf32> to vector<1x256xf32>
    %77 = vector.shape_cast %74 : vector<1x256xf32> to vector<1x1x256xf32>
    tpu.vector_store %arg11[%c1_39, %c0_40, %c0_41], %77 {strides = array<i32>} : memref<2x1x256xf32, #tpu.memory_space<vmem>>, vector<1x1x256xf32>,
    return
  }
  func.func @transform_0(%arg0: i32, %arg1: memref<4xi32, #tpu.memory_space<smem>>) -> (i32, i32) {
    %c0_i32 = arith.constant 0 : i32
    %c0_i32_0 = arith.constant 0 : i32
    return %arg0, %c0_i32 : i32, i32
  }
  func.func @transform_1(%arg0: i32, %arg1: memref<4xi32, #tpu.memory_space<smem>>) -> (i32, i32) {
    %c0_i32 = arith.constant 0 : i32
    %c0_i32_0 = arith.constant 0 : i32
    return %arg0, %c0_i32 : i32, i32
  }
  func.func @transform_2(%arg0: i32, %arg1: memref<4xi32, #tpu.memory_space<smem>>) -> (i32, i32, i32) {
    %0 = arith.index_cast %arg0 : i32 to index
    %1 = memref.load %arg1[%0] : memref<4xi32, #tpu.memory_space<smem>>
    %c0_i32 = arith.constant 0 : i32
    %c0_i32_0 = arith.constant 0 : i32
    %c0_i32_1 = arith.constant 0 : i32
    return %1, %c0_i32, %c0_i32_0 : i32, i32, i32
  }
  func.func @transform_3(%arg0: i32, %arg1: memref<4xi32, #tpu.memory_space<smem>>) -> (i32, i32, i32) {
    %0 = arith.index_cast %arg0 : i32 to index
    %1 = memref.load %arg1[%0] : memref<4xi32, #tpu.memory_space<smem>>
    %c0_i32 = arith.constant 0 : i32
    %c0_i32_0 = arith.constant 0 : i32
    %c0_i32_1 = arith.constant 0 : i32
    return %1, %c0_i32, %c0_i32_0 : i32, i32, i32
  }
  func.func @transform_4(%arg0: i32, %arg1: memref<4xi32, #tpu.memory_space<smem>>) -> (i32, i32, i32) {
    %0 = arith.index_cast %arg0 : i32 to index
    %1 = memref.load %arg1[%0] : memref<4xi32, #tpu.memory_space<smem>>
    %c0_i32 = arith.constant 0 : i32
    %c0_i32_0 = arith.constant 0 : i32
    %c0_i32_1 = arith.constant 0 : i32
    return %1, %c0_i32, %c0_i32_0 : i32, i32, i32
  }
  func.func @transform_5(%arg0: i32, %arg1: memref<4xi32, #tpu.memory_space<smem>>) -> (i32, i32, i32) {
    %0 = arith.index_cast %arg0 : i32 to index
    %1 = memref.load %arg1[%0] : memref<4xi32, #tpu.memory_space<smem>>
    %c0_i32 = arith.constant 0 : i32
    %c0_i32_0 = arith.constant 0 : i32
    %c0_i32_1 = arith.constant 0 : i32
    return %1, %c0_i32, %c0_i32_0 : i32, i32, i32
  }
  func.func @transform_6(%arg0: i32, %arg1: memref<4xi32, #tpu.memory_space<smem>>) -> (i32, i32, i32) {
    %0 = arith.index_cast %arg0 : i32 to index
    %1 = memref.load %arg1[%0] : memref<4xi32, #tpu.memory_space<smem>>
    %c0_i32 = arith.constant 0 : i32
    %c0_i32_0 = arith.constant 0 : i32
    %c0_i32_1 = arith.constant 0 : i32
    return %1, %c0_i32, %c0_i32_0 : i32, i32, i32
  }
  func.func @transform_7(%arg0: i32, %arg1: memref<4xi32, #tpu.memory_space<smem>>) -> (i32, i32, i32) {
    %0 = arith.index_cast %arg0 : i32 to index
    %1 = memref.load %arg1[%0] : memref<4xi32, #tpu.memory_space<smem>>
    %c0_i32 = arith.constant 0 : i32
    %c0_i32_0 = arith.constant 0 : i32
    %c0_i32_1 = arith.constant 0 : i32
    return %1, %c0_i32, %c0_i32_0 : i32, i32, i32
  }
  func.func @transform_8(%arg0: i32, %arg1: memref<4xi32, #tpu.memory_space<smem>>) -> (i32, i32) {
    %c0_i32 = arith.constant 0 : i32
    %c0_i32_0 = arith.constant 0 : i32
    return %arg0, %c0_i32 : i32, i32
  }
  func.func @transform_9(%arg0: i32, %arg1: memref<4xi32, #tpu.memory_space<smem>>) -> (i32, i32, i32) {
    %c0_i32 = arith.constant 0 : i32
    %c0_i32_0 = arith.constant 0 : i32
    %c0_i32_1 = arith.constant 0 : i32
    %c0_i32_2 = arith.constant 0 : i32
    return %c0_i32, %c0_i32_0, %c0_i32_1 : i32, i32, i32
  }
}

module attributes {stable_mosaic.version = 11 : i64} {
  func.func @_decode_kernel(%arg0: i32, %arg1: memref<4xi32, #tpu.memory_space<smem>>, %arg2: memref<128x256xbf16, #tpu.memory_space<vmem>>, %arg3: memref<1x256x256xbf16, #tpu.memory_space<vmem>>, %arg4: memref<1x1x256xf32, #tpu.memory_space<vmem>>, %arg5: memref<1x256x128xbf16, #tpu.memory_space<vmem>>, %arg6: memref<1x1x128xf32, #tpu.memory_space<vmem>>, %arg7: memref<128x128xf32, #tpu.memory_space<vmem>>) attributes {dimension_semantics = [#tpu.dimension_semantics<parallel>], iteration_bounds = array<i64: 4>, scalar_prefetch = 1 : i64, scratch_operands = 0 : i64, tpu.core_type = #tpu.core_type<tc>, window_params = [{transform_indices = @transform_0, window_bounds = array<i64: 128, 256>}, {transform_indices = @transform_1, window_bounds = array<i64: 1, 256, 256>}, {transform_indices = @transform_2, window_bounds = array<i64: 1, 1, 256>}, {transform_indices = @transform_3, window_bounds = array<i64: 1, 256, 128>}, {transform_indices = @transform_4, window_bounds = array<i64: 1, 1, 128>}, {transform_indices = @transform_5, window_bounds = array<i64: 128, 128>}]} {
    %c0 = arith.constant 0 : index
    %c0_0 = arith.constant 0 : index
    %0 = vector.load %arg2[%c0, %c0_0] : memref<128x256xbf16, #tpu.memory_space<vmem>>, vector<128x256xbf16>
    %c0_1 = arith.constant 0 : index
    %c0_2 = arith.constant 0 : index
    %c0_3 = arith.constant 0 : index
    %1 = vector.load %arg3[%c0_1, %c0_2, %c0_3] : memref<1x256x256xbf16, #tpu.memory_space<vmem>>, vector<1x256x256xbf16>
    %2 = vector.shape_cast %1 : vector<1x256x256xbf16> to vector<256x256xbf16>
    %cst = arith.constant dense<0.000000e+00> : vector<128x256xf32>
    %3 = tpu.matmul %0, %2, %cst {dimension_numbers = #tpu.dot_dimension_numbers<[1], [0], [0], [1], [0, 0, 1, 1], [], []>} : vector<128x256xbf16>, vector<256x256xbf16>, vector<128x256xf32> -> vector<128x256xf32>
    %c0_4 = arith.constant 0 : index
    %c0_5 = arith.constant 0 : index
    %c0_6 = arith.constant 0 : index
    %4 = vector.load %arg4[%c0_4, %c0_5, %c0_6] : memref<1x1x256xf32, #tpu.memory_space<vmem>>, vector<1x1x256xf32>
    %5 = vector.shape_cast %4 : vector<1x1x256xf32> to vector<1x256xf32>
    %6 = vector.broadcast %5 : vector<1x256xf32> to vector<128x256xf32>
    %7 = arith.addf %3, %6 : vector<128x256xf32>
    %cst_7 = arith.constant 0.000000e+00 : f32
    %8 = vector.broadcast %cst_7 : f32 to vector<128x256xf32>
    %9 = arith.maximumf %7, %8 : vector<128x256xf32>
    %10 = arith.truncf %9 : vector<128x256xf32> to vector<128x256xbf16>
    %c0_8 = arith.constant 0 : index
    %c0_9 = arith.constant 0 : index
    %c0_10 = arith.constant 0 : index
    %11 = vector.load %arg5[%c0_8, %c0_9, %c0_10] : memref<1x256x128xbf16, #tpu.memory_space<vmem>>, vector<1x256x128xbf16>
    %12 = vector.shape_cast %11 : vector<1x256x128xbf16> to vector<256x128xbf16>
    %cst_11 = arith.constant dense<0.000000e+00> : vector<128x128xf32>
    %13 = tpu.matmul %10, %12, %cst_11 {dimension_numbers = #tpu.dot_dimension_numbers<[1], [0], [0], [1], [0, 0, 1, 1], [], []>} : vector<128x256xbf16>, vector<256x128xbf16>, vector<128x128xf32> -> vector<128x128xf32>
    %c0_12 = arith.constant 0 : index
    %c0_13 = arith.constant 0 : index
    %c0_14 = arith.constant 0 : index
    %14 = vector.load %arg6[%c0_12, %c0_13, %c0_14] : memref<1x1x128xf32, #tpu.memory_space<vmem>>, vector<1x1x128xf32>
    %15 = vector.shape_cast %14 : vector<1x1x128xf32> to vector<1x128xf32>
    %16 = vector.broadcast %15 : vector<1x128xf32> to vector<128x128xf32>
    %17 = arith.addf %13, %16 : vector<128x128xf32>
    %c0_15 = arith.constant 0 : index
    %c0_16 = arith.constant 0 : index
    %18 = vector.load %arg7[%c0_15, %c0_16] : memref<128x128xf32, #tpu.memory_space<vmem>>, vector<128x128xf32>
    tpu.vector_store %arg7[%c0_15, %c0_16], %17 {strides = array<i32>} : memref<128x128xf32, #tpu.memory_space<vmem>>, vector<128x128xf32>,
    return
  }
  func.func @transform_0(%arg0: i32, %arg1: memref<4xi32, #tpu.memory_space<smem>>) -> (i32, i32) {
    %c0_i32 = arith.constant 0 : i32
    %c0_i32_0 = arith.constant 0 : i32
    return %arg0, %c0_i32 : i32, i32
  }
  func.func @transform_1(%arg0: i32, %arg1: memref<4xi32, #tpu.memory_space<smem>>) -> (i32, i32, i32) {
    %0 = arith.index_cast %arg0 : i32 to index
    %1 = memref.load %arg1[%0] : memref<4xi32, #tpu.memory_space<smem>>
    %c0_i32 = arith.constant 0 : i32
    %c0_i32_0 = arith.constant 0 : i32
    %c0_i32_1 = arith.constant 0 : i32
    return %1, %c0_i32, %c0_i32_0 : i32, i32, i32
  }
  func.func @transform_2(%arg0: i32, %arg1: memref<4xi32, #tpu.memory_space<smem>>) -> (i32, i32, i32) {
    %0 = arith.index_cast %arg0 : i32 to index
    %1 = memref.load %arg1[%0] : memref<4xi32, #tpu.memory_space<smem>>
    %c0_i32 = arith.constant 0 : i32
    %c0_i32_0 = arith.constant 0 : i32
    %c0_i32_1 = arith.constant 0 : i32
    return %1, %c0_i32, %c0_i32_0 : i32, i32, i32
  }
  func.func @transform_3(%arg0: i32, %arg1: memref<4xi32, #tpu.memory_space<smem>>) -> (i32, i32, i32) {
    %0 = arith.index_cast %arg0 : i32 to index
    %1 = memref.load %arg1[%0] : memref<4xi32, #tpu.memory_space<smem>>
    %c0_i32 = arith.constant 0 : i32
    %c0_i32_0 = arith.constant 0 : i32
    %c0_i32_1 = arith.constant 0 : i32
    return %1, %c0_i32, %c0_i32_0 : i32, i32, i32
  }
  func.func @transform_4(%arg0: i32, %arg1: memref<4xi32, #tpu.memory_space<smem>>) -> (i32, i32, i32) {
    %0 = arith.index_cast %arg0 : i32 to index
    %1 = memref.load %arg1[%0] : memref<4xi32, #tpu.memory_space<smem>>
    %c0_i32 = arith.constant 0 : i32
    %c0_i32_0 = arith.constant 0 : i32
    %c0_i32_1 = arith.constant 0 : i32
    return %1, %c0_i32, %c0_i32_0 : i32, i32, i32
  }
  func.func @transform_5(%arg0: i32, %arg1: memref<4xi32, #tpu.memory_space<smem>>) -> (i32, i32) {
    %c0_i32 = arith.constant 0 : i32
    %c0_i32_0 = arith.constant 0 : i32
    return %arg0, %c0_i32 : i32, i32
  }
}

</mosaic_0001>

<bundles_post_ra>
// kernel: mlppvcnn_forward.2
= control target key start
LH: loop header
LB: loop body
LE: loop exit
PB: predicated region body
PF: predicated region fallthrough
CT: control target
= control target key end

     0   :  { %s3162_s0 = inlined_call_operand.vmem [shape: s32[4], index: 0, kind: input, shape index: {}]   ;;  %s3163_s1 = inlined_call_operand.vmem [shape: f32[512,3], index: 1, kind: input, shape index: {}]   ;;  %s3164_s2 = inlined_call_operand.vmem [shape: s32[512,1], index: 2, kind: input, shape index: {}]   ;;  %s3165_s3 = inlined_call_operand.vmem [shape: f32[2,3,256], index: 3, kind: input, shape index: {}]   ;;  %s3166_s4 = inlined_call_operand.vmem [shape: f32[2,1,256], index: 4, kind: input, shape index: {}]   ;;  %s3167_s5 = inlined_call_operand.vmem [shape: bf16[2,256,256], index: 5, kind: input, shape index: {}]   ;;  %s3168_s6 = inlined_call_operand.vmem [shape: f32[2,1,256], index: 6, kind: input, shape index: {}]   ;;  %s3169_s7 = inlined_call_operand.vmem [shape: bf16[2,256,256], index: 7, kind: input, shape index: {}]   ;;  %s3170_s8 = inlined_call_operand.vmem [shape: f32[2,1,256], index: 8, kind: input, shape index: {}]   ;;  %s3171_s9 = inlined_call_operand.vmem [shape: bf16[512,256], index: 9, kind: output, shape index: {0}]   ;;  %s3172_s10 = inlined_call_operand.vmem [shape: f32[2,1,256], index: 10, kind: output, shape index: {1}]  }
   0x1   :  { %3175 = sst [smem:[#allocation7_spill]] %s3163_s1  ;;  %s16_s15 = sshll.u32 %s3162_s0, 4  ;;  %s17_s15 = int_to_ptr.vmem [resolvable:$true] %s16_s15 }
   0x2   :  { %3176 = sst [smem:[#allocation8_spill]] %s3164_s2  ;;  %s2527_s16 = scalar_lea.vmem %s17_s15, 16 }
   0x3   :  { %3177 = sst [smem:[#allocation9_spill]] %s3165_s3  ;;  %p2528_p0 = scmp.ne.s32.totalorder %s17_s15, %s2527_s16 }
   0x4   :  { %p2532_p1 = scmp.lt.s32.totalorder %s17_s15, %s17_s15  ;;  %p2533_p2 = scmp.lt.s32.totalorder %s2527_s16, %s2527_s16 }
   0x6   :  { %p2534_p3 = por %p2533_p2, %p2532_p1 }
   0x8   :  { %p2535_p4 = pnand %p2534_p3, %p2528_p0 }
   0xa   :  { %2538 = shalt.err (!%p2535_p4)  }
   0xb   :  { %s2549_s17 = smov [#allocation3]  }
   0xc   :  { %19 = dma.vmem_to_smem %s17_s15, 16, %s2549_s17, [#allocation2] }
   0xd   :  { %2543 = dma.done.wait [#allocation2], 16 }
   0xe   :  { %2544 = vsyncadd [#allocation2], 4294967280 }
   0xf   :  { %21 = sfence }
  0x10   :  { %s2613_s18 = smov 0  }
  0x11 LB: > { %3178 = sst [smem:[#allocation5_spill]] %s2547_s18  ;;  %s2619_s0 = sadd.s32 4294967295, %s2547_s18   ;;  %s2547_s18 = sphi %s2613_s18, %s27_s18  }
  0x12   : > { %p2265_p5 = scmp.ge.s32.totalorder %s2547_s18, 1  ;;  %p385_p6 = scmp.lt.s32.totalorder %s2547_s18, 5 }
  0x14   : > { %p386_p7 = pnand %p2265_p5, %p385_p6 }
  0x16   : > { %389 = sbr.rel (%p386_p7) target bundleno = 809 (0x329), region = 52 }
  0x1d   : > { %s2266_s19 = sshll.u32 %s2619_s0, 4  ;;  %s472_s20 = sld [smem:[#allocation3 + %s2619_s0]] }
  0x1e   : > { %p461_p8 = scmp.lt.s32.totalorder %s2266_s19, 63  ;;  %s479_s21 = sld [smem:[#allocation3 + %s2619_s0]] }
  0x1f   : > { %s485_s22 = sld [smem:[#allocation3 + %s2619_s0]]  ;;  %p2282_p1 = scmp.ne.s32.totalorder %s2619_s0, 0 }
  0x20   : > { %s492_s23 = sld [smem:[#allocation3 + %s2619_s0]]  ;;  %s3186_s19 = smov (!%p461_p8, %s2266_s19), 63  ;;  %v523_v0 = vlaneseq (!%p2282_p1)  ;;  %v2550_v1 = vmov (!%p2282_p1), -inf  }
  0x21   : > { %s498_s24 = sld [smem:[#allocation3 + %s2619_s0]]  ;;  %s2267_s26 = sshll.u32 %s3186_s19, 3 }
  0x22   : > { %s505_s25 = sld [smem:[#allocation3 + %s2619_s0]]  ;;  %vm525_vm0 = vcmp.lt.s32.totalorder (!%p2282_p1), %v523_v0, 256 }
  0x23   : > { %s2631_s27 = sld [smem:[#allocation3 + %s2619_s0]]  ;;  %p473_p9 = scmp.lt.s32.totalorder %s472_s20, 1  ;;  %527 = vst.msk [vmem:[%s3172_s10] sm:$0x3] (!%p2282_p1), %vm525_vm0, %v2550_v1  ;;  %528 = vst.msk [vmem:[%s3172_s10 + $0x2] sm:$0x3] (!%p2282_p1), %vm525_vm0, %v2550_v1 }
  0x24   : > { %s3180_s1 = sld [smem:[#allocation7_spill]]  ;;  %s3181_s2 = sld [smem:[#allocation8_spill]] }
  0x25   : > { %p480_p10 = scmp.lt.s32.totalorder %s479_s21, 1  ;;  %p486_p11 = scmp.lt.s32.totalorder %s485_s22, 1 }
  0x26   : > { %p493_p12 = scmp.lt.s32.totalorder %s492_s23, 1  ;;  %s3188_s20 = smov (!%p473_p9, %s472_s20), 1 }
  0x27   : > { %s3190_s21 = smov (!%p480_p10, %s479_s21), 1  ;;  %s2367_s14 = sshll.u32 %s3188_s20, 3 }
  0x28   : > { %p499_p13 = scmp.lt.s32.totalorder %s498_s24, 1  ;;  %s3182_s3 = sld [smem:[#allocation9_spill]] }
  0x29   : > { %3179 = sst [smem:[#allocation6_spill]] %s2631_s27  ;;  %s2272_s19 = sshll.u32 %s3190_s21, 1 }
  0x2a   : > { %s2636_s30 = scalar_lea.vmem %s3180_s1, %s2267_s26  ;;  %s2641_s13 = scalar_lea.vmem %s3181_s2, %s2267_s26 }
  0x2b   : > { %s2651_s11 = scalar_lea.vmem %s3166_s4, %s2272_s19  ;;  %p506_p0 = scmp.lt.s32.totalorder %s505_s25, 1 }
  0x2c   : > { %s3192_s22 = smov (!%p486_p11, %s485_s22), 1  ;;  %s3194_s23 = smov (!%p493_p12, %s492_s23), 1 }
  0x2d   : > { %s2368_s12 = sshll.u32 %s3192_s22, 8  ;;  %s2656_s20 = scalar_lea.vmem %s3171_s9, %s2267_s26 }
  0x2e   : > { %s2646_s17 = scalar_lea.vmem %s3182_s3, %s2367_s14  ;;  %s2661_s14 = scalar_lea.vmem %s3167_s5, %s2368_s12 }
  0x2f   : > { %s2275_s21 = sshll.u32 %s3194_s23, 1  ;;  %s3196_s24 = smov (!%p499_p13, %s498_s24), 1 }
  0x30   : > { %s2666_s19 = scalar_lea.vmem %s3168_s6, %s2275_s21  ;;  %s3198_s25 = smov (!%p506_p0, %s505_s25), 1 }
  0x31   : > { %s2369_s28 = sshll.u32 %s3196_s24, 8  ;;  %s2278_s2 = sshll.u32 %s3198_s25, 1 }
  0x32   : > { %s2671_s1 = scalar_lea.vmem %s3169_s7, %s2369_s28  ;;  %s2676_s18 = scalar_lea.vmem %s3170_s8, %s2278_s2 }
  0x33   : > { %522 = sbr.rel (%p2282_p1) target bundleno = 58 (0x3a), region = 56 }
  0x3a PF: > { %v529_v2 = vld [vmem:[%s2636_s30] sm:$0xff]  ;;  %v2551_v3 = vmov 2   ;;  %v2552_v4 = vmov 1   ;;  %v531_v5 = vld [vmem:[%s2636_s30 + $0x10] sm:$0xff]  ;;  %v530_v6 = vld [vmem:[%s2636_s30 + $0x8] sm:$0xff]  ;;  %v2553_v15 = vmov 0   ;;  %v627_v53 = vlaneseq }
  0x3b   : > { %2402 = vset.pattern.permute.xlu0 %v2551_v3  ;;  %2401 = vset.pattern.permute.xlu1 %v2552_v4  ;;  %v2431_v7 = vld [vmem:[%s2661_s14 + $0x4] ss:$8 sps:$4 sm:$0xff]   ;;  %v2433_v8 = vld [vmem:[%s2661_s14] ss:$8 sps:$4 sm:$0xff]   ;;  %v2434_v9 = vld [vmem:[%s2661_s14 + $0x14] ss:$8 sps:$4 sm:$0xff]  }
  0x3c   : > { %824 = vperm.xlu0 %2402, %v529_v2   ;;  %678 = vperm.xlu1 %2401, %v529_v2   ;;  %v533_v10 = vld [vmem:[%s2636_s30 + $0x20] sm:$0xff]  ;;  %v2436_v11 = vld [vmem:[%s2661_s14 + $0x10] ss:$8 sps:$4 sm:$0xff]   ;;  %v2440_v14 = vld [vmem:[%s2661_s14 + $0x34] ss:$8 sps:$4 sm:$0xff]   ;;  %v2778_v54 = vshrl.u32 %v627_v53, 7 }
  0x3d   : > { %1265 = vmatprep.subr.bf16.mxu0 %v2431_v7  ;;  %v2437_v12 = vld [vmem:[%s2661_s14 + $0x24] ss:$8 sps:$4 sm:$0xff]   ;;  %v2439_v13 = vld [vmem:[%s2661_s14 + $0x20] ss:$8 sps:$4 sm:$0xff]   ;;  %v2442_v16 = vld [vmem:[%s2661_s14 + $0x30] ss:$8 sps:$4 sm:$0xff]  }
  0x3e   : > { %1266 = vmatpush1.bf16.msra.mxu0 %v2433_v8  ;;  %v2443_v17 = vld [vmem:[%s2661_s14 + $0x44] ss:$8 sps:$4 sm:$0xff]   ;;  %v532_v18 = vld [vmem:[%s2636_s30 + $0x18] sm:$0xff]  ;;  %v2445_v19 = vld [vmem:[%s2661_s14 + $0x40] ss:$8 sps:$4 sm:$0xff]   ;;  %v2782_v57 = vsub.s32 1, %v2778_v54 }
  0x3f   : > { %1267 = vmatprep.subr.bf16.mxu0 %v2434_v9  ;;  %v2446_v20 = vld [vmem:[%s2661_s14 + $0x54] ss:$8 sps:$4 sm:$0xff]   ;;  %v534_v21 = vld [vmem:[%s2636_s30 + $0x28] sm:$0xff]  ;;  %v2448_v22 = vld [vmem:[%s2661_s14 + $0x50] ss:$8 sps:$4 sm:$0xff]   ;;  %v747_v58 = vsub.s32 5, %v2778_v54 }
  0x40   : > { %832 = vperm.xlu0 %2402, %v531_v5   ;;  %682 = vperm.xlu1 %2401, %v530_v6   ;;  %v2449_v23 = vld [vmem:[%s2661_s14 + $0x64] ss:$8 sps:$4 sm:$0xff]   ;;  %v2711_v24 = vld [vmem:[%s2636_s30 + $0x38] sm:$0xff]  ;;  %v2451_v25 = vld [vmem:[%s2661_s14 + $0x60] ss:$8 sps:$4 sm:$0xff]   ;;  %v2787_v60 = vsub.s32 0, %v2778_v54 }
  0x41   : > { %v2452_v26 = vld [vmem:[%s2661_s14 + $0x74] ss:$8 sps:$4 sm:$0xff]   ;;  %v2717_v27 = vld [vmem:[%s2636_s30 + $0x48] sm:$0xff]  ;;  %v2454_v28 = vld [vmem:[%s2661_s14 + $0x70] ss:$8 sps:$4 sm:$0xff]   ;;  %v633_v61 = vsub.s32 4, %v2778_v54 }
  0x42   : > { %1268 = vmatpush1.bf16.msra.mxu0 %v2436_v11  ;;  %v2455_v29 = vld [vmem:[%s2661_s14 + $0x84] ss:$8 sps:$4 sm:$0xff]   ;;  %v2724_v30 = vld [vmem:[%s2636_s30 + $0x58] sm:$0xff]  ;;  %v2457_v31 = vld [vmem:[%s2661_s14 + $0x80] ss:$8 sps:$4 sm:$0xff]   ;;  %v889_v62 = vsub.s32 2, %v2778_v54 }
  0x43   : > { %1269 = vmatprep.subr.bf16.mxu0 %v2437_v12  ;;  %v2458_v32 = vld [vmem:[%s2661_s14 + $0x94] ss:$8 sps:$4 sm:$0xff]   ;;  %v2460_v33 = vld [vmem:[%s2661_s14 + $0x90] ss:$8 sps:$4 sm:$0xff]   ;;  %v2461_v34 = vld [vmem:[%s2661_s14 + $0xa4] ss:$8 sps:$4 sm:$0xff]  }
  0x44   : > { %840 = vperm.xlu0 %2402, %v533_v10   ;;  %2403 = vset.pattern.permute.xlu1 %v2551_v3  ;;  %v535_v35 = vld [vmem:[%s2636_s30 + $0x30] sm:$0xff]  ;;  %v2463_v36 = vld [vmem:[%s2661_s14 + $0xa0] ss:$8 sps:$4 sm:$0xff]   ;;  %v2467_v40 = vld [vmem:[%s2661_s14 + $0xc4] ss:$8 sps:$4 sm:$0xff]   ;;  %v893_v63 = vsub.s32 6, %v2778_v54 }
  0x45   : > { %828 = vperm.xlu1 %2403, %v530_v6   ;;  %v2464_v37 = vld [vmem:[%s2661_s14 + $0xb4] ss:$8 sps:$4 sm:$0xff]   ;;  %v537_v38 = vld [vmem:[%s2636_s30 + $0x40] sm:$0xff]  ;;  %v2466_v39 = vld [vmem:[%s2661_s14 + $0xb0] ss:$8 sps:$4 sm:$0xff]   ;;  %s3183_s3 = sld [smem:[#allocation6_spill]] }
  0x46   : > { %1270 = vmatpush1.bf16.msra.mxu0 %v2439_v13  ;;  %v539_v41 = vld [vmem:[%s2636_s30 + $0x50] sm:$0xff]  ;;  %v541_v42 = vld [vmem:[%s2636_s30 + $0x60] sm:$0xff]  ;;  %v542_v46 = vld [vmem:[%s2636_s30 + $0x68] sm:$0xff] }
  0x47   : > { %1271 = vmatprep.subr.bf16.mxu0 %v2440_v14  ;;  %v2469_v43 = vld [vmem:[%s2661_s14 + $0xc0] ss:$8 sps:$4 sm:$0xff]   ;;  %v2470_v44 = vld [vmem:[%s2661_s14 + $0xd4] ss:$8 sps:$4 sm:$0xff]   ;;  %v2472_v45 = vld [vmem:[%s2661_s14 + $0xd0] ss:$8 sps:$4 sm:$0xff]  }
  0x48   : > { %2409 = vset.pattern.permute.xlu0 %v2553_v15  ;;  %v2473_v47 = vld [vmem:[%s2661_s14 + $0xe4] ss:$8 sps:$4 sm:$0xff]   ;;  %v2475_v48 = vld [vmem:[%s2661_s14 + $0xe0] ss:$8 sps:$4 sm:$0xff]   ;;  %v2753_v49 = vld [vmem:[%s2636_s30 + $0x78] sm:$0xff] }
  0x49   : > { %548 = vperm.xlu0 %2409, %v529_v2   ;;  %2404 = vset.pattern.permute.xlu1 %v2553_v15  ;;  %v2476_v50 = vld [vmem:[%s2661_s14 + $0xf4] ss:$8 sps:$4 sm:$0xff]   ;;  %v2478_v51 = vld [vmem:[%s2661_s14 + $0xf0] ss:$8 sps:$4 sm:$0xff]   ;;  %v545_v59 = vld [vmem:[%s2646_s17] sm:$0x77] }
  0x4a   : > { %558 = vperm.xlu1 %2404, %v531_v5   ;;  %1272 = vmatpush1.bf16.msra.mxu0 %v2442_v16  ;;  %v543_v52 = vld [vmem:[%s2636_s30 + $0x70] sm:$0xff]  ;;  %v744_v2 = vrot.slane %v545_v59, %v2782_v57  ;;  %v634_v7 = vrot.slane %v545_v59, %v633_v61  ;;  %v890_v8 = vrot.slane %v545_v59, %v889_v62 }
  0x4b   : > { %1273 = vmatprep.subr.bf16.mxu0 %v2443_v17  ;;  %v894_v9 = vrot.slane %v545_v59, %v893_v63  ;;  %p2077_p2 = scmp.eq.s32.totalorder %s3183_s3, 0  ;;  %p2106_p3 = scmp.eq.s32.totalorder %s3183_s3, 1 }
  0x4c   : > { %v2798_v11 = vrot.slane %v744_v2, %v2782_v57  ;;  %v2808_v14 = vrot.slane %v634_v7, %v2787_v60  ;;  %v2810_v16 = vrot.slane %v890_v8, %v889_v62  ;;  %v2479_v7 = vld [vmem:[%s2671_s1 + $0x4] ss:$8 sps:$4 sm:$0xff]   ;;  %v2482_v8 = vld [vmem:[%s2671_s1 + $0x14] ss:$8 sps:$4 sm:$0xff]  }
  0x4d   : > { %553 = vperm.xlu0 %2409, %v530_v6   ;;  %v630_v6 = vrot.slane %v545_v59, %v2787_v60  ;;  %v2812_v17 = vrot.slane %v894_v9, %v889_v62  ;;  %1630 = vmatprep.subr.bf16.mxu1 %v2479_v7  ;;  %s2097_s0 = scalar_select %p2077_p2, 1, 0 }
  0x4e   : > { %2405 = vset.pattern.permute.xlu1 %v2552_v4  ;;  %1274 = vmatpush1.bf16.msra.mxu0 %v2445_v19  ;;  %s2108_s25 = scalar_select %p2106_p3, 1, 0 }
  0x4f   : > { %686 = vperm.xlu1 %2405, %v531_v5   ;;  %1275 = vmatprep.subr.bf16.mxu0 %v2446_v20  ;;  %v748_v5 = vrot.slane %v545_v59, %v747_v58 }
  0x51   : > { %563 = vperm.xlu0 %2409, %v532_v18   ;;  %v2801_v12 = vrot.slane %v748_v5, %v2782_v57 }
  0x52   : > { %1276 = vmatpush1.bf16.msra.mxu0 %v2448_v22 }
  0x53   : > { %690 = vperm.xlu1 %2405, %v532_v18   ;;  %1277 = vmatprep.subr.bf16.mxu0 %v2449_v23 }
  0x55   : > { %573 = vperm.xlu0 %2409, %v534_v21  }
  0x56   : > { %1278 = vmatpush1.bf16.msra.mxu0 %v2451_v25 }
  0x57   : > { %2406 = vset.pattern.permute.xlu1 %v2551_v3  ;;  %1279 = vmatprep.subr.bf16.mxu0 %v2452_v26  ;;  %v969_v26 = vld [vmem:[%s2651_s11] sm:$0x3] }
  0x58   : > { %836 = vperm.xlu1 %2406, %v532_v18  }
  0x59   : > { %583 = vperm.xlu0 %2409, %v2711_v24  }
  0x5a   : > { %1280 = vmatpush1.bf16.msra.mxu0 %v2454_v28 }
  0x5b   : > { %1281 = vmatprep.subr.bf16.mxu0 %v2455_v29 }
  0x5c   : > { %2407 = vset.pattern.permute.xlu1 %v2553_v15 }
  0x5d   : > { %568 = vperm.xlu1 %2407, %v533_v10   ;;  %593 = vperm.xlu0 %2409, %v2717_v27  }
  0x5e   : > { %1282 = vmatpush1.bf16.msra.mxu0 %v2457_v31 }
  0x5f   : > { %1283 = vmatprep.subr.bf16.mxu0 %v2458_v32  ;;  %v2826_v32 = vrot.slane %v969_v26, %v2787_v60 }
  0x61   : > { %2408 = vset.pattern.permute.xlu1 %v2552_v4  ;;  %603 = vperm.xlu0 %2409, %v2724_v30  }
  0x62   : > { %694 = vperm.xlu1 %2408, %v533_v10   ;;  %1284 = vmatpush1.bf16.msra.mxu0 %v2460_v33  ;;  %v2829_v33 = vrot.slane %v969_v26, %v2782_v57 }
  0x63   : > { %1285 = vmatprep.subr.bf16.mxu0 %v2461_v34 }
  0x65   : > { %2418 = vset.pattern.permute.xlu0 %v2551_v3 }
  0x66   : > { %698 = vperm.xlu1 %2408, %v534_v21   ;;  %848 = vperm.xlu0 %2418, %v535_v35  }
  0x67   : > { %1286 = vmatpush1.bf16.msra.mxu0 %v2463_v36 }
  0x68   : > { %1287 = vmatprep.subr.bf16.mxu0 %v2464_v37 }
  0x6a   : > { %2410 = vset.pattern.permute.xlu1 %v2551_v3  ;;  %856 = vperm.xlu0 %2418, %v537_v38  }
  0x6b   : > { %844 = vperm.xlu1 %2410, %v534_v21   ;;  %1288 = vmatpush1.bf16.msra.mxu0 %v2466_v39 }
  0x6c   : > { %1289 = vmatprep.subr.bf16.mxu0 %v2467_v40 }
  0x6e   : > { %864 = vperm.xlu0 %2418, %v539_v41  }
  0x6f   : > { %2411 = vset.pattern.permute.xlu1 %v2553_v15  ;;  %1290 = vmatpush1.bf16.msra.mxu0 %v2469_v43 }
  0x70   : > { %578 = vperm.xlu1 %2411, %v535_v35   ;;  %1291 = vmatprep.subr.bf16.mxu0 %v2470_v44 }
  0x72   : > { %872 = vperm.xlu0 %2418, %v541_v42  }
  0x73   : > { %1292 = vmatpush1.bf16.msra.mxu0 %v2472_v45 }
  0x74   : > { %2412 = vset.pattern.permute.xlu1 %v2552_v4  ;;  %1293 = vmatprep.subr.bf16.mxu0 %v2473_v47 }
  0x75   : > { %702 = vperm.xlu1 %2412, %v535_v35  }
  0x76   : > { %2423 = vset.pattern.permute.xlu0 %v2553_v15 }
  0x77   : > { %613 = vperm.xlu0 %2423, %v542_v46   ;;  %1294 = vmatpush1.bf16.msra.mxu0 %v2475_v48 }
  0x78   : > { %1295 = vmatprep.subr.bf16.mxu0 %v2476_v50 }
  0x79   : > { %706 = vperm.xlu1 %2412, %v2711_v24  }
  0x7b   : > { %623 = vperm.xlu0 %2423, %v2753_v49   ;;  %1296 = vmatpush1.bf16.msra.mxu0 %v2478_v51 }
  0x7d   : > { %2413 = vset.pattern.permute.xlu1 %v2551_v3 }
  0x7e   : > { %852 = vperm.xlu1 %2413, %v2711_v24  }
  0x7f   : > { %2427 = vset.pattern.permute.xlu0 %v2551_v3 }
  0x80   : > { %880 = vperm.xlu0 %2427, %v543_v52  }
  0x82   : > { %2414 = vset.pattern.permute.xlu1 %v2553_v15 }
  0x83   : > { %588 = vperm.xlu1 %2414, %v537_v38  }
  0x84   : > { %2430 = vset.pattern.permute.xlu0 %v2553_v15 }
  0x87   : > { %2415 = vset.pattern.permute.xlu1 %v2552_v4 }
  0x88   : > { %710 = vperm.xlu1 %2415, %v537_v38  }
  0x8c   : > { %714 = vperm.xlu1 %2415, %v2717_v27  }
  0x90   : > { %2416 = vset.pattern.permute.xlu1 %v2551_v3 }
  0x91   : > { %860 = vperm.xlu1 %2416, %v2717_v27  }
  0x95   : > { %2417 = vset.pattern.permute.xlu1 %v2553_v15 }
  0x96   : > { %598 = vperm.xlu1 %2417, %v539_v41  }
  0x9a   : > { %2419 = vset.pattern.permute.xlu1 %v2552_v4 }
  0x9b   : > { %718 = vperm.xlu1 %2419, %v539_v41  }
  0x9f   : > { %722 = vperm.xlu1 %2419, %v2724_v30  }
  0xa3   : > { %2420 = vset.pattern.permute.xlu1 %v2551_v3 }
  0xa4   : > { %868 = vperm.xlu1 %2420, %v2724_v30  }
  0xa8   : > { %2421 = vset.pattern.permute.xlu1 %v2553_v15 }
  0xa9   : > { %608 = vperm.xlu1 %2421, %v541_v42  }
  0xad   : > { %2422 = vset.pattern.permute.xlu1 %v2552_v4 }
  0xae   : > { %726 = vperm.xlu1 %2422, %v541_v42  }
  0xb2   : > { %730 = vperm.xlu1 %2422, %v542_v46  }
  0xb6   : > { %2424 = vset.pattern.permute.xlu1 %v2551_v3 }
  0xb7   : > { %876 = vperm.xlu1 %2424, %v542_v46  }
  0xbb   : > { %2425 = vset.pattern.permute.xlu1 %v2553_v15  ;;  %v679_v55 = vpop.permute.xlu1 %678  ;;  %v825_v56 = vpop.permute.xlu0 %824 }
  0xbc   : > { %618 = vperm.xlu1 %2425, %v543_v52   ;;  %v759_v18 = vmul.f32 %v2798_v11, %v679_v55  ;;  %v760_v19 = vmul.f32 %v2801_v12, %v679_v55  ;;  %v905_v21 = vmul.f32 %v2810_v16, %v825_v56  ;;  %v906_v22 = vmul.f32 %v2812_v17, %v825_v56 }
  0xbf   : > { %v683_v0 = vpop.permute.xlu1 %682  ;;  %v833_v1 = vpop.permute.xlu0 %832 }
  0xc0   : > { %2426 = vset.pattern.permute.xlu1 %v2552_v4  ;;  %v2805_v4 = vrot.slane %v630_v6, %v2787_v60  ;;  %v761_v29 = vmul.f32 %v2798_v11, %v683_v0  ;;  %v762_v30 = vmul.f32 %v2801_v12, %v683_v0  ;;  %v910_v51 = vmul.f32 %v2812_v17, %v833_v1 }
  0xc1   : > { %734 = vperm.xlu1 %2426, %v543_v52  }
  0xc3   : > { %v2795_v10 = vpop.permute.xlu0 %840 }
  0xc4   : > { %v829_v13 = vpop.permute.xlu1 %828 }
  0xc5   : > { %738 = vperm.xlu1 %2426, %v2753_v49   ;;  %v907_v37 = vmul.f32 %v2810_v16, %v829_v13  ;;  %v908_v38 = vmul.f32 %v2812_v17, %v829_v13 }
  0xc8   : > { %v549_v20 = vpop.permute.xlu0 %548 }
  0xc9   : > { %v645_v23 = vmul.f32 %v2805_v4, %v549_v20  ;;  %v646_v24 = vmul.f32 %v2808_v14, %v549_v20  ;;  %2428 = vset.pattern.permute.xlu1 %v2551_v3  ;;  %v559_v25 = vpop.permute.xlu1 %558 }
  0xca   : > { %884 = vperm.xlu1 %2428, %v2753_v49   ;;  %v649_v44 = vmul.f32 %v2805_v4, %v559_v25  ;;  %v650_v45 = vmul.f32 %v2808_v14, %v559_v25  ;;  %v909_v49 = vmul.f32 %v2810_v16, %v833_v1  ;;  %v2481_v1 = vld [vmem:[%s2671_s1] ss:$8 sps:$4 sm:$0xff]  }
  0xcb   : > { %v791_v27 = vadd.f32 %v759_v18, %v645_v23  ;;  %v792_v28 = vadd.f32 %v760_v19, %v646_v24  ;;  %1631 = vmatpush1.bf16.msra.mxu1 %v2481_v1  ;;  %v2496_v1 = vld [vmem:[%s2671_s1 + $0x50] ss:$8 sps:$4 sm:$0xff]  }
  0xcc   : > { %v554_v31 = vpop.permute.xlu0 %553  ;;  %1632 = vmatprep.subr.bf16.mxu1 %v2482_v8 }
  0xcd   : > { %v937_v34 = vadd.f32 %v905_v21, %v791_v27  ;;  %v647_v3 = vmul.f32 %v2805_v4, %v554_v31  ;;  %v648_v35 = vmul.f32 %v2808_v14, %v554_v31  ;;  %v938_v36 = vadd.f32 %v906_v22, %v792_v28  ;;  %v2484_v27 = vld [vmem:[%s2671_s1 + $0x10] ss:$8 sps:$4 sm:$0xff]   ;;  %v2485_v28 = vld [vmem:[%s2671_s1 + $0x24] ss:$8 sps:$4 sm:$0xff]  }
  0xce   : > { %v687_v39 = vpop.permute.xlu1 %686  ;;  %2429 = vset.pattern.permute.xlu1 %v2553_v15 }
  0xcf   : > { %v793_v40 = vadd.f32 %v761_v29, %v647_v3  ;;  %v794_v41 = vadd.f32 %v762_v30, %v648_v35  ;;  %v763_v42 = vmul.f32 %v2798_v11, %v687_v39  ;;  %v764_v43 = vmul.f32 %v2801_v12, %v687_v39  ;;  %1633 = vmatpush1.bf16.msra.mxu1 %v2484_v27  ;;  %v2488_v39 = vld [vmem:[%s2671_s1 + $0x34] ss:$8 sps:$4 sm:$0xff]  }
  0xd0   : > { %v564_v46 = vpop.permute.xlu0 %563  ;;  %v982_v47 = vadd.f32 %v2829_v33, %v938_v36  ;;  %v981_v48 = vadd.f32 %v2826_v32, %v937_v34  ;;  %1634 = vmatprep.subr.bf16.mxu1 %v2485_v28  ;;  %v2500_v28 = vld [vmem:[%s2671_s1 + $0x74] ss:$8 sps:$4 sm:$0xff]  }
  0xd1   : > { %v939_v50 = vadd.f32 %v907_v37, %v793_v40  ;;  %v795_v52 = vadd.f32 %v763_v42, %v649_v44  ;;  %v796_v55 = vadd.f32 %v764_v43, %v650_v45  ;;  %v940_v58 = vadd.f32 %v908_v38, %v794_v41  ;;  %v2487_v37 = vld [vmem:[%s2671_s1 + $0x20] ss:$8 sps:$4 sm:$0xff]  }
  0xd2   : > { %v691_v56 = vpop.permute.xlu1 %690  ;;  %v651_v59 = vmul.f32 %v2805_v4, %v564_v46  ;;  %v652_v61 = vmul.f32 %v2808_v14, %v564_v46  ;;  %v1014_v2 = vmax.f32 %v982_v47, 0.0  ;;  %v1013_v6 = vmax.f32 %v981_v48, 0.0  ;;  %v2490_v46 = vld [vmem:[%s2671_s1 + $0x30] ss:$8 sps:$4 sm:$0xff]   ;;  %v2491_v48 = vld [vmem:[%s2671_s1 + $0x44] ss:$8 sps:$4 sm:$0xff]  }
  0xd3   : > { %v765_v62 = vmul.f32 %v2798_v11, %v691_v56  ;;  %v766_v63 = vmul.f32 %v2801_v12, %v691_v56  ;;  %v984_v0 = vadd.f32 %v2829_v33, %v940_v58  ;;  %v983_v5 = vadd.f32 %v2826_v32, %v939_v50  ;;  %1635 = vmatpush1.bf16.msra.mxu1 %v2487_v37  ;;  %v2493_v56 = vld [vmem:[%s2671_s1 + $0x40] ss:$8 sps:$4 sm:$0xff]  }
  0xd4   : > { %v941_v9 = vadd.f32 %v909_v49, %v795_v52  ;;  %v942_v13 = vadd.f32 %v910_v51, %v796_v55  ;;  %v574_v38 = vpop.permute.xlu0 %573  ;;  %1636 = vmatprep.subr.bf16.mxu1 %v2488_v39  ;;  %v913_v58 = vmul.f32 %v2810_v16, %v2795_v10  ;;  %v2503_v39 = vld [vmem:[%s2671_s1 + $0x84] ss:$8 sps:$4 sm:$0xff]  }
  0xd5   : > { %v1016_v18 = vmax.f32 %v984_v0, 0.0  ;;  %v1015_v19 = vmax.f32 %v983_v5, 0.0  ;;  %v797_v20 = vadd.f32 %v765_v62, %v651_v59  ;;  %v798_v21 = vadd.f32 %v766_v63, %v652_v61  ;;  %v2494_v0 = vld [vmem:[%s2671_s1 + $0x54] ss:$8 sps:$4 sm:$0xff]  }
  0xd6   : > { %v986_v31 = vadd.f32 %v2829_v33, %v942_v13  ;;  %v985_v34 = vadd.f32 %v2826_v32, %v941_v9  ;;  %v914_v59 = vmul.f32 %v2812_v17, %v2795_v10  ;;  %v656_v5 = vmul.f32 %v2808_v14, %v574_v38  ;;  %v2497_v13 = vld [vmem:[%s2671_s1 + $0x64] ss:$8 sps:$4 sm:$0xff]  }
  0xd7   : > { %v837_v22 = vpop.permute.xlu1 %836  ;;  %v1046_v25 = vpack.c.bf16 %v1016_v18, %v1014_v2  ;;  %v1045_v26 = vpack.c.bf16 %v1015_v19, %v1013_v6  ;;  %1637 = vmatpush1.bf16.msra.mxu1 %v2490_v46  ;;  %v655_v2 = vmul.f32 %v2805_v4, %v574_v38 }
  0xd8   : > { %v911_v23 = vmul.f32 %v2810_v16, %v837_v22  ;;  %v912_v24 = vmul.f32 %v2812_v17, %v837_v22  ;;  %v1018_v40 = vmax.f32 %v986_v31, 0.0  ;;  %v1017_v42 = vmax.f32 %v985_v34, 0.0  ;;  %v2869_v55 = vpop.permute.xlu0 %583  ;;  %1638 = vmatprep.subr.bf16.mxu1 %v2491_v48 }
  0xd9   : > { %1297 = vmatprep.mubr.bf16.mxu0 %v1046_v25 }
  0xda   : > { %v943_v29 = vadd.f32 %v911_v23, %v797_v20  ;;  %v944_v30 = vadd.f32 %v912_v24, %v798_v21  ;;  %1298 = vmatmul.mubr.bf16.vlgmr.msra.gmra.mrb[0].mxu0 %v1045_v26  ;;  %v2499_v23 = vld [vmem:[%s2671_s1 + $0x60] ss:$8 sps:$4 sm:$0xff]  }
  0xdb   : > { %1639 = vmatpush1.bf16.msra.mxu1 %v2493_v56 }
  0xdc   : > { %v987_v3 = vadd.f32 %v2826_v32, %v943_v29  ;;  %v988_v35 = vadd.f32 %v2829_v33, %v944_v30  ;;  %v569_v36 = vpop.permute.xlu1 %568  ;;  %v2882_v10 = vpop.permute.xlu0 %593  ;;  %1640 = vmatprep.subr.bf16.mxu1 %v2494_v0 }
  0xdd   : > { %v653_v51 = vmul.f32 %v2805_v4, %v569_v36  ;;  %v654_v52 = vmul.f32 %v2808_v14, %v569_v36 }
  0xde   : > { %v1020_v41 = vmax.f32 %v988_v35, 0.0  ;;  %v1019_v43 = vmax.f32 %v987_v3, 0.0  ;;  %v2502_v3 = vld [vmem:[%s2671_s1 + $0x70] ss:$8 sps:$4 sm:$0xff]  }
  0xdf   : > { %1641 = vmatpush1.bf16.msra.mxu1 %v2496_v1 }
  0xe0   : > { %v1048_v44 = vpack.c.bf16 %v1020_v41, %v1018_v40  ;;  %v1047_v45 = vpack.c.bf16 %v1019_v43, %v1017_v42  ;;  %1642 = vmatprep.subr.bf16.mxu1 %v2497_v13  ;;  %v2893_v34 = vpop.permute.xlu0 %603  ;;  %v2505_v43 = vld [vmem:[%s2671_s1 + $0x80] ss:$8 sps:$4 sm:$0xff]  }
  0xe1   : > { %v695_v47 = vpop.permute.xlu1 %694 }
  0xe2   : > { %v767_v49 = vmul.f32 %v2798_v11, %v695_v47  ;;  %v768_v50 = vmul.f32 %v2801_v12, %v695_v47  ;;  %1307 = vmatprep.mubr.bf16.mxu0 %v1048_v44  ;;  %v2506_v47 = vld [vmem:[%s2671_s1 + $0x94] ss:$8 sps:$4 sm:$0xff]  }
  0xe3   : > { %1308 = vmatmul.mubr.bf16.gmra.mrb[4].mxu0 %v1047_v45  ;;  %1643 = vmatpush1.bf16.msra.mxu1 %v2499_v23  ;;  %v2514_v23 = vld [vmem:[%s2671_s1 + $0xb0] ss:$8 sps:$4 sm:$0xff]  }
  0xe4   : > { %v799_v61 = vadd.f32 %v767_v49, %v653_v51  ;;  %v800_v62 = vadd.f32 %v768_v50, %v654_v52  ;;  %1644 = vmatprep.subr.bf16.mxu1 %v2500_v28 }
  0xe5   : > { %v699_v63 = vpop.permute.xlu1 %698  ;;  %v849_v46 = vpop.permute.xlu0 %848 }
  0xe6   : > { %v769_v6 = vmul.f32 %v2798_v11, %v699_v63  ;;  %v770_v7 = vmul.f32 %v2801_v12, %v699_v63  ;;  %v945_v8 = vadd.f32 %v913_v58, %v799_v61  ;;  %v946_v9 = vadd.f32 %v914_v59, %v800_v62  ;;  %v2508_v59 = vld [vmem:[%s2671_s1 + $0x90] ss:$8 sps:$4 sm:$0xff]   ;;  %v2509_v61 = vld [vmem:[%s2671_s1 + $0xa4] ss:$8 sps:$4 sm:$0xff]  }
  0xe7   : > { %1645 = vmatpush1.bf16.msra.mxu1 %v2502_v3  ;;  %v917_v52 = vmul.f32 %v2810_v16, %v849_v46  ;;  %v918_v56 = vmul.f32 %v2812_v17, %v849_v46  ;;  %v659_v62 = vmul.f32 %v2805_v4, %v2869_v55  ;;  %v660_v63 = vmul.f32 %v2808_v14, %v2869_v55  ;;  %v2517_v3 = vld [vmem:[%s2671_s1 + $0xc0] ss:$8 sps:$4 sm:$0xff]  }
  0xe8   : > { %v801_v19 = vadd.f32 %v769_v6, %v655_v2  ;;  %v802_v20 = vadd.f32 %v770_v7, %v656_v5  ;;  %v990_v26 = vadd.f32 %v2829_v33, %v946_v9  ;;  %v989_v27 = vadd.f32 %v2826_v32, %v945_v8  ;;  %1646 = vmatprep.subr.bf16.mxu1 %v2503_v39  ;;  %v2511_v7 = vld [vmem:[%s2671_s1 + $0xa0] ss:$8 sps:$4 sm:$0xff]   ;;  %v2512_v8 = vld [vmem:[%s2671_s1 + $0xb4] ss:$8 sps:$4 sm:$0xff]  }
  0xea   : > { %v845_v18 = vpop.permute.xlu1 %844  ;;  %v1022_v35 = vmax.f32 %v990_v26, 0.0  ;;  %v1021_v37 = vmax.f32 %v989_v27, 0.0 }
  0xeb   : > { %v915_v21 = vmul.f32 %v2810_v16, %v845_v18  ;;  %v916_v22 = vmul.f32 %v2812_v17, %v845_v18  ;;  %1647 = vmatpush1.bf16.msra.mxu1 %v2505_v43 }
  0xec   : > { %1648 = vmatprep.subr.bf16.mxu1 %v2506_v47 }
  0xed   : > { %v947_v24 = vadd.f32 %v915_v21, %v801_v19  ;;  %v948_v25 = vadd.f32 %v916_v22, %v802_v20 }
  0xef   : > { %v991_v29 = vadd.f32 %v2826_v32, %v947_v24  ;;  %v992_v30 = vadd.f32 %v2829_v33, %v948_v25  ;;  %v579_v31 = vpop.permute.xlu1 %578  ;;  %1649 = vmatpush1.bf16.msra.mxu1 %v2508_v59  ;;  %v2515_v24 = vld [vmem:[%s2671_s1 + $0xc4] ss:$8 sps:$4 sm:$0xff]  }
  0xf0   : > { %v657_v48 = vmul.f32 %v2805_v4, %v579_v31  ;;  %v658_v49 = vmul.f32 %v2808_v14, %v579_v31  ;;  %1650 = vmatprep.subr.bf16.mxu1 %v2509_v61 }
  0xf1   : > { %v1024_v36 = vmax.f32 %v992_v30, 0.0  ;;  %v1023_v38 = vmax.f32 %v991_v29, 0.0 }
  0xf3   : > { %v1050_v40 = vpack.c.bf16 %v1024_v36, %v1022_v35  ;;  %v1049_v41 = vpack.c.bf16 %v1023_v38, %v1021_v37  ;;  %1651 = vmatpush1.bf16.msra.mxu1 %v2511_v7  ;;  %v2518_v35 = vld [vmem:[%s2671_s1 + $0xd4] ss:$8 sps:$4 sm:$0xff]  }
  0xf4   : > { %v703_v42 = vpop.permute.xlu1 %702  ;;  %1652 = vmatprep.subr.bf16.mxu1 %v2512_v8 }
  0xf5   : > { %v771_v44 = vmul.f32 %v2798_v11, %v703_v42  ;;  %v772_v45 = vmul.f32 %v2801_v12, %v703_v42  ;;  %1317 = vmatprep.mubr.bf16.mxu0 %v1050_v40 }
  0xf6   : > { %1318 = vmatmul.mubr.bf16.gmra.mrb[8].mxu0 %v1049_v41  ;;  %v857_v41 = vpop.permute.xlu0 %856 }
  0xf7   : > { %v803_v50 = vadd.f32 %v771_v44, %v657_v48  ;;  %v804_v51 = vadd.f32 %v772_v45, %v658_v49  ;;  %1653 = vmatpush1.bf16.msra.mxu1 %v2514_v23  ;;  %v921_v46 = vmul.f32 %v2810_v16, %v857_v41  ;;  %v922_v47 = vmul.f32 %v2812_v17, %v857_v41 }
  0xf8   : > { %v707_v58 = vpop.permute.xlu1 %706  ;;  %1654 = vmatprep.subr.bf16.mxu1 %v2515_v24  ;;  %v663_v49 = vmul.f32 %v2805_v4, %v2882_v10 }
  0xf9   : > { %v773_v0 = vmul.f32 %v2798_v11, %v707_v58  ;;  %v774_v2 = vmul.f32 %v2801_v12, %v707_v58  ;;  %v949_v5 = vadd.f32 %v917_v52, %v803_v50  ;;  %v950_v6 = vadd.f32 %v918_v56, %v804_v51 }
  0xfa   : > { %v664_v50 = vmul.f32 %v2808_v14, %v2882_v10  ;;  %v865_v24 = vpop.permute.xlu0 %864 }
  0xfb   : > { %v805_v9 = vadd.f32 %v773_v0, %v659_v62  ;;  %v806_v13 = vadd.f32 %v774_v2, %v660_v63  ;;  %v993_v55 = vadd.f32 %v2826_v32, %v949_v5  ;;  %v994_v20 = vadd.f32 %v2829_v33, %v950_v6  ;;  %1655 = vmatpush1.bf16.msra.mxu1 %v2517_v3 }
  0xfc   : > { %1656 = vmatprep.subr.bf16.mxu1 %v2518_v35 }
  0xfd   : > { %v853_v1 = vpop.permute.xlu1 %852  ;;  %v1026_v28 = vmax.f32 %v994_v20, 0.0  ;;  %v1025_v30 = vmax.f32 %v993_v55, 0.0 }
  0xfe   : > { %v919_v18 = vmul.f32 %v2810_v16, %v853_v1  ;;  %v920_v19 = vmul.f32 %v2812_v17, %v853_v1 }
 0x100   : > { %v951_v21 = vadd.f32 %v919_v18, %v805_v9  ;;  %v952_v22 = vadd.f32 %v920_v19, %v806_v13 }
 0x102   : > { %v995_v25 = vadd.f32 %v2826_v32, %v951_v21  ;;  %v996_v26 = vadd.f32 %v2829_v33, %v952_v22  ;;  %v589_v27 = vpop.permute.xlu1 %588 }
 0x103   : > { %v661_v42 = vmul.f32 %v2805_v4, %v589_v27  ;;  %v662_v43 = vmul.f32 %v2808_v14, %v589_v27 }
 0x104   : > { %v1028_v29 = vmax.f32 %v996_v26, 0.0  ;;  %v1027_v31 = vmax.f32 %v995_v25, 0.0 }
 0x106   : > { %v1052_v36 = vpack.c.bf16 %v1028_v29, %v1026_v28  ;;  %v1051_v37 = vpack.c.bf16 %v1027_v31, %v1025_v30  ;;  %v925_v29 = vmul.f32 %v2810_v16, %v865_v24  ;;  %v926_v30 = vmul.f32 %v2812_v17, %v865_v24  ;;  %v2524_v24 = vld [vmem:[%s2671_s1 + $0xf4] ss:$8 sps:$4 sm:$0xff]  }
 0x107   : > { %v711_v38 = vpop.permute.xlu1 %710 }
 0x108   : > { %v775_v39 = vmul.f32 %v2798_v11, %v711_v38  ;;  %v776_v40 = vmul.f32 %v2801_v12, %v711_v38  ;;  %1327 = vmatprep.mubr.bf16.mxu0 %v1052_v36  ;;  %v667_v36 = vmul.f32 %v2805_v4, %v2893_v34 }
 0x109   : > { %1328 = vmatmul.mubr.bf16.gmra.mrb[12].mxu0 %v1051_v37  ;;  %v668_v37 = vmul.f32 %v2808_v14, %v2893_v34 }
 0x10a   : > { %v807_v44 = vadd.f32 %v775_v39, %v661_v42  ;;  %v808_v45 = vadd.f32 %v776_v40, %v662_v43 }
 0x10b   : > { %v715_v48 = vpop.permute.xlu1 %714 }
 0x10c   : > { %v777_v51 = vmul.f32 %v2798_v11, %v715_v48  ;;  %v778_v52 = vmul.f32 %v2801_v12, %v715_v48  ;;  %v953_v56 = vadd.f32 %v921_v46, %v807_v44  ;;  %v954_v58 = vadd.f32 %v922_v47, %v808_v45 }
 0x10e   : > { %v809_v61 = vadd.f32 %v777_v51, %v663_v49  ;;  %v810_v62 = vadd.f32 %v778_v52, %v664_v50  ;;  %v997_v2 = vadd.f32 %v2826_v32, %v953_v56  ;;  %v998_v5 = vadd.f32 %v2829_v33, %v954_v58 }
 0x110   : > { %v861_v59 = vpop.permute.xlu1 %860  ;;  %v1030_v9 = vmax.f32 %v998_v5, 0.0  ;;  %v1029_v18 = vmax.f32 %v997_v2, 0.0 }
 0x111   : > { %v923_v63 = vmul.f32 %v2810_v16, %v861_v59  ;;  %v924_v0 = vmul.f32 %v2812_v17, %v861_v59  ;;  %v873_v59 = vpop.permute.xlu0 %872 }
 0x113   : > { %v955_v6 = vadd.f32 %v923_v63, %v809_v61  ;;  %v956_v7 = vadd.f32 %v924_v0, %v810_v62  ;;  %v2520_v63 = vld [vmem:[%s2671_s1 + $0xd0] ss:$8 sps:$4 sm:$0xff]  }
 0x114   : > { %1657 = vmatpush1.bf16.msra.mxu1 %v2520_v63 }
 0x115   : > { %v999_v10 = vadd.f32 %v2826_v32, %v955_v6  ;;  %v1000_v1 = vadd.f32 %v2829_v33, %v956_v7  ;;  %v599_v8 = vpop.permute.xlu1 %598 }
 0x116   : > { %v665_v25 = vmul.f32 %v2805_v4, %v599_v8  ;;  %v666_v26 = vmul.f32 %v2808_v14, %v599_v8  ;;  %v2523_v8 = vld [vmem:[%s2671_s1 + $0xe0] ss:$8 sps:$4 sm:$0xff]  }
 0x117   : > { %v1032_v13 = vmax.f32 %v1000_v1, 0.0  ;;  %v1031_v19 = vmax.f32 %v999_v10, 0.0  ;;  %v2521_v10 = vld [vmem:[%s2671_s1 + $0xe4] ss:$8 sps:$4 sm:$0xff]   ;;  %v614_v1 = vpop.permute.xlu0 %613 }
 0x118   : > { %1658 = vmatprep.subr.bf16.mxu1 %v2521_v10 }
 0x119   : > { %v1054_v55 = vpack.c.bf16 %v1032_v13, %v1030_v9  ;;  %v1053_v20 = vpack.c.bf16 %v1031_v19, %v1029_v18  ;;  %v929_v19 = vmul.f32 %v2810_v16, %v873_v59  ;;  %1659 = vmatpush1.bf16.msra.mxu1 %v2523_v8 }
 0x11a   : > { %v719_v21 = vpop.permute.xlu1 %718  ;;  %1660 = vmatprep.subr.bf16.mxu1 %v2524_v24 }
 0x11b   : > { %v779_v22 = vmul.f32 %v2798_v11, %v719_v21  ;;  %v780_v23 = vmul.f32 %v2801_v12, %v719_v21  ;;  %1337 = vmatprep.mubr.bf16.mxu0 %v1054_v55  ;;  %v930_v55 = vmul.f32 %v2812_v17, %v873_v59  ;;  %v672_v21 = vmul.f32 %v2808_v14, %v614_v1 }
 0x11c   : > { %1338 = vmatmul.mubr.bf16.gmra.mrb[16].mxu0 %v1053_v20  ;;  %v671_v20 = vmul.f32 %v2805_v4, %v614_v1 }
 0x11d   : > { %v811_v27 = vadd.f32 %v779_v22, %v665_v25  ;;  %v812_v28 = vadd.f32 %v780_v23, %v666_v26  ;;  %v2526_v25 = vld [vmem:[%s2671_s1 + $0xf0] ss:$8 sps:$4 sm:$0xff]  }
 0x11e   : > { %v723_v31 = vpop.permute.xlu1 %722  ;;  %1661 = vmatpush1.bf16.msra.mxu1 %v2526_v25  ;;  %v3000_v25 = vstv %s3183_s3 }
 0x11f   : > { %v781_v3 = vmul.f32 %v2798_v11, %v723_v31  ;;  %v782_v35 = vmul.f32 %v2801_v12, %v723_v31  ;;  %v957_v38 = vadd.f32 %v925_v29, %v811_v27  ;;  %v958_v39 = vadd.f32 %v926_v30, %v812_v28 }
 0x121   : > { %v813_v41 = vadd.f32 %v781_v3, %v667_v36  ;;  %v814_v42 = vadd.f32 %v782_v35, %v668_v37  ;;  %v1001_v45 = vadd.f32 %v2826_v32, %v957_v38  ;;  %v1002_v46 = vadd.f32 %v2829_v33, %v958_v39 }
 0x123   : > { %v869_v40 = vpop.permute.xlu1 %868  ;;  %v1034_v51 = vmax.f32 %v1002_v46, 0.0  ;;  %v1033_v56 = vmax.f32 %v1001_v45, 0.0 }
 0x124   : > { %v927_v43 = vmul.f32 %v2810_v16, %v869_v40  ;;  %v928_v44 = vmul.f32 %v2812_v17, %v869_v40 }
 0x126   : > { %v959_v47 = vadd.f32 %v927_v43, %v813_v41  ;;  %v960_v48 = vadd.f32 %v928_v44, %v814_v42  ;;  %v624_v42 = vpop.permute.xlu0 %623 }
 0x128   : > { %v1003_v49 = vadd.f32 %v2826_v32, %v959_v47  ;;  %v1004_v34 = vadd.f32 %v2829_v33, %v960_v48  ;;  %v609_v50 = vpop.permute.xlu1 %608 }
 0x129   : > { %v669_v6 = vmul.f32 %v2805_v4, %v609_v50  ;;  %v670_v7 = vmul.f32 %v2808_v14, %v609_v50 }
 0x12a   : > { %v1036_v52 = vmax.f32 %v1004_v34, 0.0  ;;  %v1035_v58 = vmax.f32 %v1003_v49, 0.0 }
 0x12c   : > { %v1056_v61 = vpack.c.bf16 %v1036_v52, %v1034_v51  ;;  %v1055_v62 = vpack.c.bf16 %v1035_v58, %v1033_v56  ;;  %v881_v51 = vpop.permute.xlu0 %880 }
 0x12d   : > { %v727_v0 = vpop.permute.xlu1 %726 }
 0x12e   : > { %v783_v2 = vmul.f32 %v2798_v11, %v727_v0  ;;  %v784_v5 = vmul.f32 %v2801_v12, %v727_v0  ;;  %1347 = vmatprep.mubr.bf16.mxu0 %v1056_v61  ;;  %v933_v61 = vmul.f32 %v2810_v16, %v881_v51 }
 0x12f   : > { %1348 = vmatmul.mubr.bf16.gmra.mrb[20].mxu0 %v1055_v62  ;;  %v934_v62 = vmul.f32 %v2812_v17, %v881_v51  ;;  %v1894_v51 = vld [vmem:[%s2641_s13 + $0x38] sm:$0xff] }
 0x130   : > { %v815_v9 = vadd.f32 %v783_v2, %v669_v6  ;;  %v816_v13 = vadd.f32 %v784_v5, %v670_v7  ;;  %v675_v5 = vmul.f32 %v2805_v4, %v624_v42  ;;  %v676_v6 = vmul.f32 %v2808_v14, %v624_v42 }
 0x131   : > { %v731_v18 = vpop.permute.xlu1 %730  ;;  %vm1911_vm8 = vcmp.eq.s32.totalorder %v1894_v51, %v3000_v25 }
 0x132   : > { %v785_v22 = vmul.f32 %v2798_v11, %v731_v18  ;;  %v786_v23 = vmul.f32 %v2801_v12, %v731_v18  ;;  %v961_v26 = vadd.f32 %v929_v19, %v815_v9  ;;  %v962_v27 = vadd.f32 %v930_v55, %v816_v13 }
 0x134   : > { %v817_v29 = vadd.f32 %v785_v22, %v671_v20  ;;  %v818_v30 = vadd.f32 %v786_v23, %v672_v21  ;;  %v1006_v37 = vadd.f32 %v2829_v33, %v962_v27  ;;  %v1005_v38 = vadd.f32 %v2826_v32, %v961_v26  ;;  %v1888_v26 = vld [vmem:[%s2641_s13 + $0x8] sm:$0xff]  ;;  %v1889_v27 = vld [vmem:[%s2641_s13 + $0x10] sm:$0xff] }
 0x135   : > { %vm1905_vm2 = vcmp.eq.s32.totalorder %v1888_v26, %v3000_v25  ;;  %vm1906_vm3 = vcmp.eq.s32.totalorder %v1889_v27, %v3000_v25 }
 0x136   : > { %v877_v28 = vpop.permute.xlu1 %876  ;;  %v1038_v43 = vmax.f32 %v1006_v37, 0.0  ;;  %v1037_v45 = vmax.f32 %v1005_v38, 0.0  ;;  %v1892_v37 = vld [vmem:[%s2641_s13 + $0x28] sm:$0xff] }
 0x137   : > { %v931_v31 = vmul.f32 %v2810_v16, %v877_v28  ;;  %v932_v3 = vmul.f32 %v2812_v17, %v877_v28  ;;  %v1922_v28 = vsel %vm1906_vm3, 1, %v2553_v15  ;;  %vm1909_vm6 = vcmp.eq.s32.totalorder %v1892_v37, %v3000_v25 }
 0x139   : > { %v963_v35 = vadd.f32 %v931_v31, %v817_v29  ;;  %v964_v36 = vadd.f32 %v932_v3, %v818_v30  ;;  %v1890_v29 = vld [vmem:[%s2641_s13 + $0x18] sm:$0xff]  ;;  %v1093_v31 = vld [vmem:[%s2666_s19] sm:$0x3] }
 0x13a   : > { %vm1907_vm4 = vcmp.eq.s32.totalorder %v1890_v29, %v3000_v25  ;;  %v1891_v3 = vld [vmem:[%s2641_s13 + $0x20] sm:$0xff]  ;;  %v3022_v38 = vrot.slane %v1093_v31, %v2782_v57 }
 0x13b   : > { %v1007_v39 = vadd.f32 %v2826_v32, %v963_v35  ;;  %v1008_v40 = vadd.f32 %v2829_v33, %v964_v36  ;;  %v619_v41 = vpop.permute.xlu1 %618  ;;  %v1923_v30 = vsel %vm1907_vm4, 1, %v2553_v15  ;;  %vm1908_vm5 = vcmp.eq.s32.totalorder %v1891_v3, %v3000_v25 }
 0x13c   : > { %v673_v52 = vmul.f32 %v2805_v4, %v619_v41  ;;  %v674_v56 = vmul.f32 %v2808_v14, %v619_v41  ;;  %v3017_v35 = vrot.slane %v1093_v31, %v2787_v60  ;;  %v1924_v36 = vsel %vm1908_vm5, 1, %v2553_v15 }
 0x13d   : > { %v1040_v44 = vmax.f32 %v1008_v40, 0.0  ;;  %v1039_v46 = vmax.f32 %v1007_v39, 0.0  ;;  %v1925_v39 = vsel %vm1909_vm6, 1, %v2553_v15 }
 0x13f   : > { %v1058_v47 = vpack.c.bf16 %v1040_v44, %v1038_v43  ;;  %v1057_v48 = vpack.c.bf16 %v1039_v46, %v1037_v45 }
 0x140   : > { %v735_v49 = vpop.permute.xlu1 %734 }
 0x141   : > { %v787_v34 = vmul.f32 %v2798_v11, %v735_v49  ;;  %v788_v50 = vmul.f32 %v2801_v12, %v735_v49  ;;  %1357 = vmatprep.mubr.bf16.mxu0 %v1058_v47 }
 0x142   : > { %1358 = vmatmul.mubr.bf16.gmra.mrb[24].mxu0 %v1057_v48 }
 0x143   : > { %v819_v58 = vadd.f32 %v787_v34, %v673_v52  ;;  %v820_v59 = vadd.f32 %v788_v50, %v674_v56  ;;  %v1893_v50 = vld [vmem:[%s2641_s13 + $0x30] sm:$0xff]  ;;  %v1895_v52 = vld [vmem:[%s2641_s13 + $0x40] sm:$0xff] }
 0x144   : > { %v739_v63 = vpop.permute.xlu1 %738  ;;  %vm1910_vm7 = vcmp.eq.s32.totalorder %v1893_v50, %v3000_v25  ;;  %vm1912_vm9 = vcmp.eq.s32.totalorder %v1895_v52, %v3000_v25 }
 0x145   : > { %v789_v0 = vmul.f32 %v2798_v11, %v739_v63  ;;  %v790_v2 = vmul.f32 %v2801_v12, %v739_v63  ;;  %v965_v7 = vadd.f32 %v933_v61, %v819_v58  ;;  %v966_v10 = vadd.f32 %v934_v62, %v820_v59  ;;  %v1896_v58 = vld [vmem:[%s2641_s13 + $0x48] sm:$0xff]  ;;  %v1897_v63 = vld [vmem:[%s2641_s13 + $0x50] sm:$0xff] }
 0x146   : > { %v1926_v61 = vsel %vm1910_vm7, 1, %v2553_v15  ;;  %v1927_v62 = vsel %vm1911_vm8, 1, %v2553_v15  ;;  %vm1913_vm10 = vcmp.eq.s32.totalorder %v1896_v58, %v3000_v25  ;;  %vm1914_vm11 = vcmp.eq.s32.totalorder %v1897_v63, %v3000_v25 }
 0x147   : > { %v821_v8 = vadd.f32 %v789_v0, %v675_v5  ;;  %v822_v9 = vadd.f32 %v790_v2, %v676_v6  ;;  %v1009_v19 = vadd.f32 %v2826_v32, %v965_v7  ;;  %v1010_v11 = vadd.f32 %v2829_v33, %v966_v10  ;;  %v1898_v0 = vld [vmem:[%s2641_s13 + $0x58] sm:$0xff] }
 0x148   : > { %v1928_v10 = vsel %vm1912_vm9, 1, %v2553_v15  ;;  %vm1915_vm12 = vcmp.eq.s32.totalorder %v1898_v0, %v3000_v25 }
 0x149   : > { %v885_v1 = vpop.permute.xlu1 %884  ;;  %v1042_v20 = vmax.f32 %v1010_v11, 0.0  ;;  %v1041_v22 = vmax.f32 %v1009_v19, 0.0  ;;  %v1900_v19 = vld [vmem:[%s2641_s13 + $0x68] sm:$0xff]  ;;  %v1899_v11 = vld [vmem:[%s2641_s13 + $0x60] sm:$0xff] }
 0x14a   : > { %v935_v13 = vmul.f32 %v2810_v16, %v885_v1  ;;  %v936_v18 = vmul.f32 %v2812_v17, %v885_v1  ;;  %v1887_v17 = vld [vmem:[%s2641_s13] sm:$0xff]  ;;  %v1929_v1 = vsel %vm1913_vm10, 1, %v2553_v15  ;;  %vm1917_vm13 = vcmp.eq.s32.totalorder %v1900_v19, %v3000_v25 }
 0x14b   : > { %vm1904_vm1 = vcmp.eq.s32.totalorder %v1887_v17, %v3000_v25  ;;  %vm1916_vm14 = vcmp.eq.s32.totalorder %v1899_v11, %v3000_v25  ;;  %v1933_v26 = vsel %vm1917_vm13, 1, %v2553_v15 }
 0x14c   : > { %v967_v12 = vadd.f32 %v935_v13, %v821_v8  ;;  %v968_v4 = vadd.f32 %v936_v18, %v822_v9 }
 0x14e   : > { %v1011_v14 = vadd.f32 %v2826_v32, %v967_v12  ;;  %v1012_v55 = vadd.f32 %v2829_v33, %v968_v4  ;;  %v1920_v32 = vsel %vm1904_vm1, 1, %v2553_v15  ;;  %v1921_v33 = vsel %vm1905_vm2, 1, %v2553_v15 }
 0x14f   : > { %1937 = vperm.xlu1 %2429, %v1920_v32   ;;  %1940 = vperm.xlu0 %2430, %v1921_v33   ;;  %v1932_v32 = vsel %vm1916_vm14, 1, %v2553_v15 }
 0x150   : > { %v1044_v21 = vmax.f32 %v1012_v55, 0.0  ;;  %v1043_v16 = vmax.f32 %v1011_v14, 0.0  ;;  %v1930_v55 = vsel %vm1914_vm11, 1, %v2553_v15 }
 0x152   : > { %v1060_v23 = vpack.c.bf16 %v1044_v21, %v1042_v20  ;;  %v1059_v24 = vpack.c.bf16 %v1043_v16, %v1041_v22  ;;  %v1931_v20 = vsel %vm1915_vm12, 1, %v2553_v15 }
 0x153   : > { %1943 = vperm.xlu1 %2429, %v1922_v28   ;;  %1949 = vperm.xlu0 %2430, %v1924_v36  }
 0x154   : > { %1367 = vmatprep.mubr.bf16.mxu0 %v1060_v23  ;;  %v1902_v23 = vld [vmem:[%s2641_s13 + $0x78] sm:$0xff] }
 0x155   : > { %1368 = vmatmul.mubr.bf16.gmra.mrb[28].mxu0 %v1059_v24  ;;  %v1901_v24 = vld [vmem:[%s2641_s13 + $0x70] sm:$0xff]  ;;  %vm1919_vm15 = vcmp.eq.s32.totalorder %v1902_v23, %v3000_v25 }
 0x156   : > { %vm1918_vm0 = vcmp.eq.s32.totalorder %v1901_v24, %v3000_v25  ;;  %v1935_v33 = vsel %vm1919_vm15, 1, %v2553_v15 }
 0x157   : > { %1946 = vperm.xlu1 %2429, %v1923_v30   ;;  %1955 = vperm.xlu0 %2430, %v1926_v61   ;;  %v1934_v27 = vsel %vm1918_vm0, 1, %v2553_v15 }
 0x15b   : > { %1952 = vperm.xlu1 %2429, %v1925_v39   ;;  %1961 = vperm.xlu0 %2430, %v1928_v10  }
 0x15f   : > { %1958 = vperm.xlu1 %2429, %v1927_v62   ;;  %1967 = vperm.xlu0 %2430, %v1930_v55  }
 0x163   : > { %1964 = vperm.xlu1 %2429, %v1929_v1   ;;  %1973 = vperm.xlu0 %2430, %v1932_v32  }
 0x167   : > { %1970 = vperm.xlu1 %2429, %v1931_v20   ;;  %1979 = vperm.xlu0 %2430, %v1934_v27  }
 0x16b   : > { %1976 = vperm.xlu1 %2429, %v1933_v26  }
 0x16f   : > { %1982 = vperm.xlu1 %2429, %v1935_v33  }
 0x1ad   : > { %v1299_v40 = vpop.f32.mrb[0].mxu0 }
 0x1ae   : > { %v1300_v41 = vadd.f32 %v1299_v40, %v3017_v35  ;;  %v1301_v42 = vpop.f32.mrb[1].mxu0 }
 0x1af   : > { %v1302_v43 = vadd.f32 %v1301_v42, %v3022_v38  ;;  %v1303_v44 = vpop.f32.mrb[2].mxu0 }
 0x1b0   : > { %v1304_v45 = vadd.f32 %v1303_v44, %v3017_v35  ;;  %v1305_v46 = vpop.f32.mrb[3].mxu0  ;;  %v1378_v48 = vmax.f32 %v1300_v41, 0.0 }
 0x1b1   : > { %v1306_v47 = vadd.f32 %v1305_v46, %v3022_v38  ;;  %v1379_v49 = vmax.f32 %v1302_v43, 0.0 }
 0x1b2   : > { %v1380_v34 = vmax.f32 %v1304_v45, 0.0 }
 0x1b3   : > { %v1381_v56 = vmax.f32 %v1306_v47, 0.0 }
 0x1b4   : > { %v1410_v59 = vpack.c.bf16 %v1380_v34, %v1378_v48 }
 0x1b5   : > { %v1411_v5 = vpack.c.bf16 %v1381_v56, %v1379_v49 }
 0x1b6   : > { %v1309_v2 = vpop.f32.mrb[4].mxu0 }
 0x1b7   : > { %v1310_v6 = vadd.f32 %v1309_v2, %v3017_v35  ;;  %v1311_v7 = vpop.f32.mrb[5].mxu0  ;;  %1662 = vmatprep.mubr.bf16.mxu1 %v1411_v5 }
 0x1b8   : > { %v1312_v8 = vadd.f32 %v1311_v7, %v3022_v38  ;;  %v1313_v9 = vpop.f32.mrb[6].mxu0  ;;  %1663 = vmatmul.mubr.bf16.vlgmr.msra.gmra.mrb[0].mxu1 %v1410_v59 }
 0x1b9   : > { %v1314_v13 = vadd.f32 %v1313_v9, %v3017_v35  ;;  %v1315_v18 = vpop.f32.mrb[7].mxu0  ;;  %v1382_v4 = vmax.f32 %v1310_v6, 0.0 }
 0x1ba   : > { %v1316_v12 = vadd.f32 %v1315_v18, %v3022_v38  ;;  %v1383_v21 = vmax.f32 %v1312_v8, 0.0 }
 0x1bb   : > { %v1384_v14 = vmax.f32 %v1314_v13, 0.0 }
 0x1bc   : > { %v1385_v22 = vmax.f32 %v1316_v12, 0.0 }
 0x1bd   : > { %v1412_v16 = vpack.c.bf16 %v1384_v14, %v1382_v4 }
 0x1be   : > { %v1413_v17 = vpack.c.bf16 %v1385_v22, %v1383_v21 }
 0x1c0   : > { %1672 = vmatprep.mubr.bf16.mxu1 %v1413_v17 }
 0x1c1   : > { %1673 = vmatmul.mubr.bf16.gmra.mrb[4].mxu1 %v1412_v16 }
 0x1c9   : > { %v1319_v28 = vpop.f32.mrb[8].mxu0 }
 0x1ca   : > { %v1320_v29 = vadd.f32 %v1319_v28, %v3017_v35  ;;  %v1321_v30 = vpop.f32.mrb[9].mxu0 }
 0x1cb   : > { %v1322_v31 = vadd.f32 %v1321_v30, %v3022_v38  ;;  %v1323_v3 = vpop.f32.mrb[10].mxu0 }
 0x1cc   : > { %v1324_v36 = vadd.f32 %v1323_v3, %v3017_v35  ;;  %v1325_v37 = vpop.f32.mrb[11].mxu0  ;;  %v1386_v39 = vmax.f32 %v1320_v29, 0.0 }
 0x1cd   : > { %v1326_v25 = vadd.f32 %v1325_v37, %v3022_v38  ;;  %v1387_v41 = vmax.f32 %v1322_v31, 0.0 }
 0x1ce   : > { %v1388_v40 = vmax.f32 %v1324_v36, 0.0 }
 0x1cf   : > { %v1389_v42 = vmax.f32 %v1326_v25, 0.0 }
 0x1d0   : > { %v1414_v43 = vpack.c.bf16 %v1388_v40, %v1386_v39 }
 0x1d1   : > { %v1415_v15 = vpack.c.bf16 %v1389_v42, %v1387_v41 }
 0x1d3   : > { %1682 = vmatprep.mubr.bf16.mxu1 %v1415_v15 }
 0x1d4   : > { %1683 = vmatmul.mubr.bf16.gmra.mrb[8].mxu1 %v1414_v43 }
 0x1dc   : > { %v1329_v44 = vpop.f32.mrb[12].mxu0 }
 0x1dd   : > { %v1330_v45 = vadd.f32 %v1329_v44, %v3017_v35  ;;  %v1331_v46 = vpop.f32.mrb[13].mxu0 }
 0x1de   : > { %v1332_v47 = vadd.f32 %v1331_v46, %v3022_v38  ;;  %v1333_v48 = vpop.f32.mrb[14].mxu0 }
 0x1df   : > { %v1334_v49 = vadd.f32 %v1333_v48, %v3017_v35  ;;  %v1335_v34 = vpop.f32.mrb[15].mxu0  ;;  %v1390_v51 = vmax.f32 %v1330_v45, 0.0 }
 0x1e0   : > { %v1336_v50 = vadd.f32 %v1335_v34, %v3022_v38  ;;  %v1391_v56 = vmax.f32 %v1332_v47, 0.0 }
 0x1e1   : > { %v1392_v52 = vmax.f32 %v1334_v49, 0.0 }
 0x1e2   : > { %v1393_v58 = vmax.f32 %v1336_v50, 0.0 }
 0x1e3   : > { %v1416_v59 = vpack.c.bf16 %v1392_v52, %v1390_v51 }
 0x1e4   : > { %v1417_v61 = vpack.c.bf16 %v1393_v58, %v1391_v56 }
 0x1e6   : > { %1692 = vmatprep.mubr.bf16.mxu1 %v1417_v61 }
 0x1e7   : > { %1693 = vmatmul.mubr.bf16.gmra.mrb[12].mxu1 %v1416_v59  ;;  %v1458_v59 = vld [vmem:[%s2676_s18] sm:$0x3] }
 0x1e8   : > { %v3090_v61 = vrot.slane %v1458_v59, %v2787_v60 }
 0x1ef   : > { %v1339_v62 = vpop.f32.mrb[16].mxu0 }
 0x1f0   : > { %v1340_v63 = vadd.f32 %v1339_v62, %v3017_v35  ;;  %v1341_v0 = vpop.f32.mrb[17].mxu0  ;;  %v3093_v62 = vrot.slane %v1458_v59, %v2782_v57 }
 0x1f1   : > { %v1342_v2 = vadd.f32 %v1341_v0, %v3022_v38  ;;  %v1343_v5 = vpop.f32.mrb[18].mxu0 }
 0x1f2   : > { %v1344_v6 = vadd.f32 %v1343_v5, %v3017_v35  ;;  %v1345_v7 = vpop.f32.mrb[19].mxu0  ;;  %v1394_v1 = vmax.f32 %v1340_v63, 0.0 }
 0x1f3   : > { %v1346_v10 = vadd.f32 %v1345_v7, %v3022_v38  ;;  %v1395_v9 = vmax.f32 %v1342_v2, 0.0 }
 0x1f4   : > { %v1396_v8 = vmax.f32 %v1344_v6, 0.0 }
 0x1f5   : > { %v1397_v13 = vmax.f32 %v1346_v10, 0.0 }
 0x1f6   : > { %v1418_v18 = vpack.c.bf16 %v1396_v8, %v1394_v1 }
 0x1f7   : > { %v1419_v19 = vpack.c.bf16 %v1397_v13, %v1395_v9 }
 0x1f9   : > { %1702 = vmatprep.mubr.bf16.mxu1 %v1419_v19  ;;  %v1941_v19 = vpop.permute.xlu0 %1940 }
 0x1fa   : > { %1703 = vmatmul.mubr.bf16.gmra.mrb[16].mxu1 %v1418_v18  ;;  %vm1985_vm3 = vcmp.eq.s32.totalorder %v1941_v19, 1 }
 0x202   : > { %v1349_v11 = vpop.f32.mrb[20].mxu0 }
 0x203   : > { %v1350_v12 = vadd.f32 %v1349_v11, %v3017_v35  ;;  %v1351_v4 = vpop.f32.mrb[21].mxu0 }
 0x204   : > { %v1352_v14 = vadd.f32 %v1351_v4, %v3022_v38  ;;  %v1353_v55 = vpop.f32.mrb[22].mxu0 }
 0x205   : > { %v1354_v20 = vadd.f32 %v1353_v55, %v3017_v35  ;;  %v1355_v21 = vpop.f32.mrb[23].mxu0  ;;  %v1398_v16 = vmax.f32 %v1350_v12, 0.0 }
 0x206   : > { %v1356_v22 = vadd.f32 %v1355_v21, %v3022_v38  ;;  %v1399_v24 = vmax.f32 %v1352_v14, 0.0 }
 0x207   : > { %v1400_v23 = vmax.f32 %v1354_v20, 0.0 }
 0x208   : > { %v1401_v17 = vmax.f32 %v1356_v22, 0.0 }
 0x209   : > { %v1420_v26 = vpack.c.bf16 %v1400_v23, %v1398_v16 }
 0x20a   : > { %v1421_v32 = vpack.c.bf16 %v1401_v17, %v1399_v24 }
 0x20c   : > { %1712 = vmatprep.mubr.bf16.mxu1 %v1421_v32 }
 0x20d   : > { %1713 = vmatmul.mubr.bf16.gmra.mrb[20].mxu1 %v1420_v26 }
 0x215   : > { %v1359_v33 = vpop.f32.mrb[24].mxu0 }
 0x216   : > { %v1360_v27 = vadd.f32 %v1359_v33, %v3017_v35  ;;  %v1361_v28 = vpop.f32.mrb[25].mxu0 }
 0x217   : > { %v1362_v29 = vadd.f32 %v1361_v28, %v3022_v38  ;;  %v1363_v30 = vpop.f32.mrb[26].mxu0 }
 0x218   : > { %v1364_v31 = vadd.f32 %v1363_v30, %v3017_v35  ;;  %v1365_v3 = vpop.f32.mrb[27].mxu0  ;;  %v1402_v37 = vmax.f32 %v1360_v27, 0.0 }
 0x219   : > { %v1366_v36 = vadd.f32 %v1365_v3, %v3022_v38  ;;  %v1403_v39 = vmax.f32 %v1362_v29, 0.0 }
 0x21a   : > { %v1404_v25 = vmax.f32 %v1364_v31, 0.0 }
 0x21b   : > { %v1405_v40 = vmax.f32 %v1366_v36, 0.0 }
 0x21c   : > { %v1422_v41 = vpack.c.bf16 %v1404_v25, %v1402_v37 }
 0x21d   : > { %v1423_v42 = vpack.c.bf16 %v1405_v40, %v1403_v39 }
 0x21f   : > { %1722 = vmatprep.mubr.bf16.mxu1 %v1423_v42  ;;  %v1950_v42 = vpop.permute.xlu0 %1949 }
 0x220   : > { %1723 = vmatmul.mubr.bf16.gmra.mrb[24].mxu1 %v1422_v41  ;;  %vm1988_vm5 = vcmp.eq.s32.totalorder %v1950_v42, 1 }
 0x228   : > { %v1369_v43 = vpop.f32.mrb[28].mxu0 }
 0x229   : > { %v1370_v15 = vadd.f32 %v1369_v43, %v3017_v35  ;;  %v1371_v44 = vpop.f32.mrb[29].mxu0 }
 0x22a   : > { %v1372_v45 = vadd.f32 %v1371_v44, %v3022_v38  ;;  %v1373_v46 = vpop.f32.mrb[30].mxu0 }
 0x22b   : > { %v1374_v47 = vadd.f32 %v1373_v46, %v3017_v35  ;;  %v1375_v48 = vpop.f32.mrb[31].mxu0  ;;  %v1406_v34 = vmax.f32 %v1370_v15, 0.0  ;;  %v1938_v35 = vpop.permute.xlu1 %1937 }
 0x22c   : > { %v1376_v49 = vadd.f32 %v1375_v48, %v3022_v38  ;;  %v1407_v51 = vmax.f32 %v1372_v45, 0.0  ;;  %vm1984_vm1 = vcmp.eq.s32.totalorder %v1938_v35, 1 }
 0x22d   : > { %v1408_v50 = vmax.f32 %v1374_v47, 0.0 }
 0x22e   : > { %v1409_v52 = vmax.f32 %v1376_v49, 0.0 }
 0x22f   : > { %v1424_v56 = vpack.c.bf16 %v1408_v50, %v1406_v34  ;;  %v1944_v1 = vpop.permute.xlu1 %1943 }
 0x230   : > { %v1425_v58 = vpack.c.bf16 %v1409_v52, %v1407_v51  ;;  %vm1986_vm2 = vcmp.eq.s32.totalorder %v1944_v1, 1 }
 0x232   : > { %1732 = vmatprep.mubr.bf16.mxu1 %v1425_v58 }
 0x233   : > { %1733 = vmatmul.mubr.bf16.gmra.mrb[28].mxu1 %v1424_v56  ;;  %v1947_v14 = vpop.permute.xlu1 %1946 }
 0x234   : > { %vm1987_vm4 = vcmp.eq.s32.totalorder %v1947_v14, 1 }
 0x237   : > { %v1953_v45 = vpop.permute.xlu1 %1952 }
 0x238   : > { %vm1989_vm6 = vcmp.eq.s32.totalorder %v1953_v45, 1 }
 0x28b   : > { %v1664_v63 = vpop.f32.mrb[0].mxu1 }
 0x28c   : > { %v1665_v38 = vadd.f32 %v1664_v63, %v3090_v61  ;;  %v1666_v0 = vpop.f32.mrb[1].mxu1 }
 0x28d   : > { %v1667_v2 = vadd.f32 %v1666_v0, %v3093_v62  ;;  %v1668_v5 = vpop.f32.mrb[2].mxu1 }
 0x28e   : > { %v1743_v6 = vmax.f32 %v1665_v38, 0.0  ;;  %v1669_v7 = vadd.f32 %v1668_v5, %v3090_v61  ;;  %v1670_v10 = vpop.f32.mrb[3].mxu1 }
 0x28f   : > { %v1744_v60 = vmax.f32 %v1667_v2, 0.0  ;;  %v1671_v8 = vadd.f32 %v1670_v10, %v3093_v62  ;;  %v1956_v10 = vpop.permute.xlu0 %1955 }
 0x290   : > { %v1745_v57 = vmax.f32 %v1669_v7, 0.0  ;;  %v2000_v17 = vsel %vm1984_vm1, %v1743_v6, -inf  ;;  %vm1990_vm7 = vcmp.eq.s32.totalorder %v1956_v10, 1 }
 0x291   : > { %v2371_v9 = vpack.c.bf16 %v1744_v60, %v1743_v6  ;;  %v1746_v13 = vmax.f32 %v1671_v8, 0.0  ;;  %v2001_v26 = vsel %vm1984_vm1, %v1744_v60, -inf }
 0x292   : > { %v2002_v31 = vsel %vm1985_vm3, %v1745_v57, -inf }
 0x293   : > { %1871 = vst [vmem:[%s2656_s20] sm:$0xff] %v2371_v9  ;;  %v2372_v18 = vpack.c.bf16 %v1746_v13, %v1745_v57  ;;  %v2003_v37 = vsel %vm1985_vm3, %v1746_v13, -inf  ;;  %v1959_v57 = vpop.permute.xlu1 %1958  ;;  %vm2103_vm3 = vcmp.lt.s32.totalorder %v627_v53, 256 }
 0x294   : > { %v1674_v11 = vpop.f32.mrb[4].mxu1  ;;  %vm1991_vm8 = vcmp.eq.s32.totalorder %v1959_v57, 1 }
 0x295   : > { %v1675_v12 = vadd.f32 %v1674_v11, %v3090_v61  ;;  %v1676_v4 = vpop.f32.mrb[5].mxu1  ;;  %1872 = vst [vmem:[%s2656_s20 + $0x8] sm:$0xff] %v2372_v18 }
 0x296   : > { %v1677_v55 = vadd.f32 %v1676_v4, %v3093_v62  ;;  %v1678_v20 = vpop.f32.mrb[6].mxu1 }
 0x297   : > { %v1747_v21 = vmax.f32 %v1675_v12, 0.0  ;;  %v1679_v22 = vadd.f32 %v1678_v20, %v3090_v61  ;;  %v1680_v16 = vpop.f32.mrb[7].mxu1 }
 0x298   : > { %v1748_v23 = vmax.f32 %v1677_v55, 0.0  ;;  %v1681_v24 = vadd.f32 %v1680_v16, %v3093_v62 }
 0x299   : > { %v2004_v32 = vsel %vm1986_vm2, %v1747_v21, -inf  ;;  %v1749_v33 = vmax.f32 %v1679_v22, 0.0 }
 0x29a   : > { %v2373_v27 = vpack.c.bf16 %v1748_v23, %v1747_v21  ;;  %v2005_v28 = vsel %vm1986_vm2, %v1748_v23, -inf  ;;  %v2032_v29 = vmax.f32 %v2000_v17, %v2004_v32  ;;  %v1750_v30 = vmax.f32 %v1681_v24, 0.0 }
 0x29b   : > { %v2053_v3 = vmax.f32 %v2001_v26, %v2005_v28  ;;  %v2006_v36 = vsel %vm1987_vm4, %v1749_v33, -inf }
 0x29c   : > { %1873 = vst [vmem:[%s2656_s20 + $0x10] sm:$0xff] %v2373_v27  ;;  %v2374_v25 = vpack.c.bf16 %v1750_v30, %v1749_v33  ;;  %v2007_v39 = vsel %vm1987_vm4, %v1750_v30, -inf  ;;  %v2033_v40 = vmax.f32 %v2002_v31, %v2006_v36  ;;  %v1962_v27 = vpop.permute.xlu0 %1961  ;;  %v1965_v31 = vpop.permute.xlu1 %1964 }
 0x29d   : > { %v2054_v41 = vmax.f32 %v2003_v37, %v2007_v39  ;;  %vm1992_vm9 = vcmp.eq.s32.totalorder %v1962_v27, 1  ;;  %vm1993_vm10 = vcmp.eq.s32.totalorder %v1965_v31, 1 }
 0x29e   : > { %1874 = vst [vmem:[%s2656_s20 + $0x18] sm:$0xff] %v2374_v25 }
 0x2a7   : > { %v1684_v43 = vpop.f32.mrb[8].mxu1 }
 0x2a8   : > { %v1685_v15 = vadd.f32 %v1684_v43, %v3090_v61  ;;  %v1686_v44 = vpop.f32.mrb[9].mxu1 }
 0x2a9   : > { %v1687_v46 = vadd.f32 %v1686_v44, %v3093_v62  ;;  %v1688_v47 = vpop.f32.mrb[10].mxu1 }
 0x2aa   : > { %v1751_v48 = vmax.f32 %v1685_v15, 0.0  ;;  %v1689_v49 = vadd.f32 %v1688_v47, %v3090_v61  ;;  %v1690_v34 = vpop.f32.mrb[11].mxu1 }
 0x2ab   : > { %v1752_v50 = vmax.f32 %v1687_v46, 0.0  ;;  %v1691_v51 = vadd.f32 %v1690_v34, %v3093_v62 }
 0x2ac   : > { %v1753_v52 = vmax.f32 %v1689_v49, 0.0  ;;  %v2008_v56 = vsel %vm1988_vm5, %v1751_v48, -inf }
 0x2ad   : > { %v2375_v58 = vpack.c.bf16 %v1752_v50, %v1751_v48  ;;  %v2009_v59 = vsel %vm1988_vm5, %v1752_v50, -inf  ;;  %v2034_v35 = vmax.f32 %v2032_v29, %v2008_v56  ;;  %v1754_v63 = vmax.f32 %v1691_v51, 0.0 }
 0x2ae   : > { %v2055_v38 = vmax.f32 %v2053_v3, %v2009_v59  ;;  %v2010_v0 = vsel %vm1989_vm6, %v1753_v52, -inf }
 0x2af   : > { %1875 = vst [vmem:[%s2656_s20 + $0x20] sm:$0xff] %v2375_v58  ;;  %v2376_v2 = vpack.c.bf16 %v1754_v63, %v1753_v52  ;;  %v2011_v5 = vsel %vm1989_vm6, %v1754_v63, -inf  ;;  %v2035_v6 = vmax.f32 %v2033_v40, %v2010_v0  ;;  %v1968_v52 = vpop.permute.xlu0 %1967 }
 0x2b0   : > { %v2056_v7 = vmax.f32 %v2054_v41, %v2011_v5  ;;  %vm1994_vm11 = vcmp.eq.s32.totalorder %v1968_v52, 1 }
 0x2b1   : > { %1876 = vst [vmem:[%s2656_s20 + $0x28] sm:$0xff] %v2376_v2 }
 0x2ba   : > { %v1694_v1 = vpop.f32.mrb[12].mxu1 }
 0x2bb   : > { %v1695_v60 = vadd.f32 %v1694_v1, %v3090_v61  ;;  %v1696_v8 = vpop.f32.mrb[13].mxu1 }
 0x2bc   : > { %v1697_v9 = vadd.f32 %v1696_v8, %v3093_v62  ;;  %v1698_v13 = vpop.f32.mrb[14].mxu1 }
 0x2bd   : > { %v1755_v18 = vmax.f32 %v1695_v60, 0.0  ;;  %v1699_v19 = vadd.f32 %v1698_v13, %v3090_v61  ;;  %v1700_v11 = vpop.f32.mrb[15].mxu1 }
 0x2be   : > { %v1756_v12 = vmax.f32 %v1697_v9, 0.0  ;;  %v1701_v4 = vadd.f32 %v1700_v11, %v3093_v62 }
 0x2bf   : > { %v1757_v14 = vmax.f32 %v1699_v19, 0.0  ;;  %v2012_v55 = vsel %vm1990_vm7, %v1755_v18, -inf }
 0x2c0   : > { %v2377_v20 = vpack.c.bf16 %v1756_v12, %v1755_v18  ;;  %v2013_v21 = vsel %vm1990_vm7, %v1756_v12, -inf  ;;  %v2036_v22 = vmax.f32 %v2034_v35, %v2012_v55  ;;  %v1758_v16 = vmax.f32 %v1701_v4, 0.0  ;;  %v1971_v35 = vpop.permute.xlu1 %1970 }
 0x2c1   : > { %v2057_v23 = vmax.f32 %v2055_v38, %v2013_v21  ;;  %v2014_v24 = vsel %vm1991_vm8, %v1757_v14, -inf  ;;  %vm1995_vm12 = vcmp.eq.s32.totalorder %v1971_v35, 1 }
 0x2c2   : > { %1877 = vst [vmem:[%s2656_s20 + $0x30] sm:$0xff] %v2377_v20  ;;  %v2378_v17 = vpack.c.bf16 %v1758_v16, %v1757_v14  ;;  %v2015_v26 = vsel %vm1991_vm8, %v1758_v16, -inf  ;;  %v2037_v32 = vmax.f32 %v2035_v6, %v2014_v24  ;;  %v1974_v16 = vpop.permute.xlu0 %1973 }
 0x2c3   : > { %v2058_v33 = vmax.f32 %v2056_v7, %v2015_v26  ;;  %vm1996_vm13 = vcmp.eq.s32.totalorder %v1974_v16, 1 }
 0x2c4   : > { %1878 = vst [vmem:[%s2656_s20 + $0x38] sm:$0xff] %v2378_v17  ;;  %v1977_v26 = vpop.permute.xlu1 %1976 }
 0x2c5   : > { %vm1997_vm14 = vcmp.eq.s32.totalorder %v1977_v26, 1  ;;  %v2363_v26 = vld [vmem:[%s3172_s10 + $0x2] sm:$0x3] }
 0x2cd   : > { %v1704_v28 = vpop.f32.mrb[16].mxu1 }
 0x2ce   : > { %v1705_v29 = vadd.f32 %v1704_v28, %v3090_v61  ;;  %v1706_v30 = vpop.f32.mrb[17].mxu1 }
 0x2cf   : > { %v1707_v3 = vadd.f32 %v1706_v30, %v3093_v62  ;;  %v1708_v36 = vpop.f32.mrb[18].mxu1 }
 0x2d0   : > { %v1759_v37 = vmax.f32 %v1705_v29, 0.0  ;;  %v1709_v25 = vadd.f32 %v1708_v36, %v3090_v61  ;;  %v1710_v39 = vpop.f32.mrb[19].mxu1 }
 0x2d1   : > { %v1760_v40 = vmax.f32 %v1707_v3, 0.0  ;;  %v1711_v41 = vadd.f32 %v1710_v39, %v3093_v62 }
 0x2d2   : > { %v1761_v42 = vmax.f32 %v1709_v25, 0.0  ;;  %v2016_v43 = vsel %vm1992_vm9, %v1759_v37, -inf }
 0x2d3   : > { %v2379_v15 = vpack.c.bf16 %v1760_v40, %v1759_v37  ;;  %v2017_v44 = vsel %vm1992_vm9, %v1760_v40, -inf  ;;  %v2038_v45 = vmax.f32 %v2036_v22, %v2016_v43  ;;  %v1762_v46 = vmax.f32 %v1711_v41, 0.0  ;;  %v1980_v43 = vpop.permute.xlu0 %1979 }
 0x2d4   : > { %v2059_v47 = vmax.f32 %v2057_v23, %v2017_v44  ;;  %v2018_v48 = vsel %vm1993_vm10, %v1761_v42, -inf  ;;  %vm1998_vm15 = vcmp.eq.s32.totalorder %v1980_v43, 1 }
 0x2d5   : > { %1879 = vst [vmem:[%s2656_s20 + $0x40] sm:$0xff] %v2379_v15  ;;  %v2380_v49 = vpack.c.bf16 %v1762_v46, %v1761_v42  ;;  %v2019_v34 = vsel %vm1993_vm10, %v1762_v46, -inf  ;;  %v2039_v50 = vmax.f32 %v2037_v32, %v2018_v48 }
 0x2d6   : > { %v2060_v51 = vmax.f32 %v2058_v33, %v2019_v34 }
 0x2d7   : > { %1880 = vst [vmem:[%s2656_s20 + $0x48] sm:$0xff] %v2380_v49 }
 0x2e0   : > { %v1714_v56 = vpop.f32.mrb[20].mxu1 }
 0x2e1   : > { %v1715_v58 = vadd.f32 %v1714_v56, %v3090_v61  ;;  %v1716_v59 = vpop.f32.mrb[21].mxu1 }
 0x2e2   : > { %v1717_v63 = vadd.f32 %v1716_v59, %v3093_v62  ;;  %v1718_v38 = vpop.f32.mrb[22].mxu1 }
 0x2e3   : > { %v1763_v0 = vmax.f32 %v1715_v58, 0.0  ;;  %v1719_v2 = vadd.f32 %v1718_v38, %v3090_v61  ;;  %v1720_v5 = vpop.f32.mrb[23].mxu1 }
 0x2e4   : > { %v1764_v6 = vmax.f32 %v1717_v63, 0.0  ;;  %v1721_v7 = vadd.f32 %v1720_v5, %v3093_v62 }
 0x2e5   : > { %v1765_v10 = vmax.f32 %v1719_v2, 0.0  ;;  %v2020_v1 = vsel %vm1994_vm11, %v1763_v0, -inf }
 0x2e6   : > { %v2381_v60 = vpack.c.bf16 %v1764_v6, %v1763_v0  ;;  %v2021_v8 = vsel %vm1994_vm11, %v1764_v6, -inf  ;;  %v2040_v57 = vmax.f32 %v2038_v45, %v2020_v1  ;;  %v1766_v9 = vmax.f32 %v1721_v7, 0.0  ;;  %v1983_v45 = vpop.permute.xlu1 %1982 }
 0x2e7   : > { %v2061_v13 = vmax.f32 %v2059_v47, %v2021_v8  ;;  %v2022_v18 = vsel %vm1995_vm12, %v1765_v10, -inf  ;;  %vm1999_vm0 = vcmp.eq.s32.totalorder %v1983_v45, 1 }
 0x2e8   : > { %1881 = vst [vmem:[%s2656_s20 + $0x50] sm:$0xff] %v2381_v60  ;;  %v2382_v19 = vpack.c.bf16 %v1766_v9, %v1765_v10  ;;  %v2023_v11 = vsel %vm1995_vm12, %v1766_v9, -inf  ;;  %v2041_v12 = vmax.f32 %v2039_v50, %v2022_v18 }
 0x2e9   : > { %v2062_v4 = vmax.f32 %v2060_v51, %v2023_v11 }
 0x2ea   : > { %1882 = vst [vmem:[%s2656_s20 + $0x58] sm:$0xff] %v2382_v19 }
 0x2f3   : > { %v1724_v14 = vpop.f32.mrb[24].mxu1 }
 0x2f4   : > { %v1725_v55 = vadd.f32 %v1724_v14, %v3090_v61  ;;  %v1726_v20 = vpop.f32.mrb[25].mxu1 }
 0x2f5   : > { %v1727_v21 = vadd.f32 %v1726_v20, %v3093_v62  ;;  %v1728_v22 = vpop.f32.mrb[26].mxu1 }
 0x2f6   : > { %v1767_v23 = vmax.f32 %v1725_v55, 0.0  ;;  %v1729_v24 = vadd.f32 %v1728_v22, %v3090_v61  ;;  %v1730_v17 = vpop.f32.mrb[27].mxu1 }
 0x2f7   : > { %v1768_v32 = vmax.f32 %v1727_v21, 0.0  ;;  %v1731_v33 = vadd.f32 %v1730_v17, %v3093_v62  ;;  %v2074_v17 = vld [vmem:[%s3172_s10] sm:$0x3] }
 0x2f8   : > { %v2024_v27 = vsel %vm1996_vm13, %v1767_v23, -inf  ;;  %v1769_v28 = vmax.f32 %v1729_v24, 0.0  ;;  %v2109_v24 = vstv %s2108_s25 }
 0x2f9   : > { %v2042_v29 = vmax.f32 %v2040_v57, %v2024_v27  ;;  %v2383_v30 = vpack.c.bf16 %v1768_v32, %v1767_v23  ;;  %v2025_v31 = vsel %vm1996_vm13, %v1768_v32, -inf  ;;  %v1770_v3 = vmax.f32 %v1731_v33, 0.0 }
 0x2fa   : > { %v2063_v36 = vmax.f32 %v2061_v13, %v2025_v31  ;;  %v2026_v37 = vsel %vm1997_vm14, %v1769_v28, -inf  ;;  %v2554_v57 = vmov 1966171168   ;;  %v2098_v23 = vstv %s2097_s0 }
 0x2fb   : > { %1883 = vst [vmem:[%s2656_s20 + $0x60] sm:$0xff] %v2383_v30  ;;  %v2043_v25 = vmax.f32 %v2041_v12, %v2026_v37  ;;  %v2384_v39 = vpack.c.bf16 %v1770_v3, %v1769_v28  ;;  %v2027_v40 = vsel %vm1997_vm14, %v1770_v3, -inf  ;;  %v2082_v9 = vunpack.c.l.s4 %v2554_v57 }
 0x2fc   : > { %v2064_v41 = vmax.f32 %v2062_v4, %v2027_v40  ;;  %vm2099_vm1 = vcmp.eq.s32.totalorder %v2098_v23, 1  ;;  %vm2110_vm2 = vcmp.eq.s32.totalorder %v2109_v24, 1 }
 0x2fd   : > { %1884 = vst [vmem:[%s2656_s20 + $0x68] sm:$0xff] %v2384_v39  ;;  %v2083_v12 = vunpack.c.0.s8 %v2082_v9 }
 0x2ff   : > { %v2086_v21 = vsub.s32 %v2083_v12, %v2778_v54 }
 0x306   : > { %v1734_v42 = vpop.f32.mrb[28].mxu1 }
 0x307   : > { %v1735_v15 = vadd.f32 %v1734_v42, %v3090_v61  ;;  %v1736_v44 = vpop.f32.mrb[29].mxu1 }
 0x308   : > { %v1737_v46 = vadd.f32 %v1736_v44, %v3093_v62  ;;  %v1738_v47 = vpop.f32.mrb[30].mxu1 }
 0x309   : > { %v1771_v48 = vmax.f32 %v1735_v15, 0.0  ;;  %v1739_v49 = vadd.f32 %v1738_v47, %v3090_v61  ;;  %v1740_v34 = vpop.f32.mrb[31].mxu1 }
 0x30a   : > { %v1772_v50 = vmax.f32 %v1737_v46, 0.0  ;;  %v1741_v51 = vadd.f32 %v1740_v34, %v3093_v62 }
 0x30b   : > { %v2028_v52 = vsel %vm1998_vm15, %v1771_v48, -inf  ;;  %v1773_v56 = vmax.f32 %v1739_v49, 0.0 }
 0x30c   : > { %v2044_v58 = vmax.f32 %v2042_v29, %v2028_v52  ;;  %v2385_v59 = vpack.c.bf16 %v1772_v50, %v1771_v48  ;;  %v2029_v35 = vsel %vm1998_vm15, %v1772_v50, -inf  ;;  %v1774_v63 = vmax.f32 %v1741_v51, 0.0 }
 0x30d   : > { %v2065_v38 = vmax.f32 %v2063_v36, %v2029_v35  ;;  %v2030_v0 = vsel %vm1999_vm0, %v1773_v56, -inf }
 0x30e   : > { %1885 = vst [vmem:[%s2656_s20 + $0x70] sm:$0xff] %v2385_v59  ;;  %v2045_v2 = vmax.f32 %v2043_v25, %v2030_v0  ;;  %v2386_v5 = vpack.c.bf16 %v1774_v63, %v1773_v56  ;;  %v2031_v61 = vsel %vm1999_vm0, %v1774_v63, -inf }
 0x30f   : > { %v2066_v6 = vmax.f32 %v2064_v41, %v2031_v61 }
 0x310   : > { %v2046_v7 = vmax.f32 %v2044_v58, %v2045_v2  ;;  %1886 = vst [vmem:[%s2656_s20 + $0x78] sm:$0xff] %v2386_v5 }
 0x311   : > { %v2067_v62 = vmax.f32 %v2065_v38, %v2066_v6 }
 0x312   : > { %v2047_v10 = vrot.slane %v2046_v7, 4 }
 0x313   : > { %v2068_v1 = vrot.slane %v2067_v62, 4 }
 0x314   : > { %v2048_v60 = vmax.f32 %v2046_v7, %v2047_v10 }
 0x315   : > { %v2069_v8 = vmax.f32 %v2067_v62, %v2068_v1 }
 0x316   : > { %v2049_v13 = vrot.slane %v2048_v60, 2 }
 0x317   : > { %v2070_v18 = vrot.slane %v2069_v8, 2 }
 0x318   : > { %v2050_v19 = vmax.f32 %v2048_v60, %v2049_v13 }
 0x319   : > { %v2071_v11 = vmax.f32 %v2069_v8, %v2070_v18 }
 0x31a   : > { %v2051_v4 = vrot.slane %v2050_v19, 1 }
 0x31b   : > { %v2072_v14 = vrot.slane %v2071_v11, 1 }
 0x31c   : > { %v2052_v55 = vmax.f32 %v2050_v19, %v2051_v4 }
 0x31d   : > { %v2073_v20 = vmax.f32 %v2071_v11, %v2072_v14 }
 0x31f   : > { %v2080_v22 = vcombine.low %v2052_v55, %v2073_v20 }
 0x321   : > { %v2087_v16 = vrot.slane %v2080_v22, %v2086_v21 }
 0x323   : > { %v2094_v32 = vrot.slane %v2087_v16, %v2086_v21 }
 0x325   : > { %v2096_v33 = vmax.f32 %v2074_v17, %v2094_v32  ;;  %v2107_v54 = vmax.f32 %v2363_v26, %v2094_v32 }
 0x327   : > { %v2100_v27 = vsel %vm2099_vm1, %v2096_v33, %v2074_v17  ;;  %v2111_v28 = vsel %vm2110_vm2, %v2107_v54, %v2363_v26 }
 0x328   : > { %2105 = vst.msk [vmem:[%s3172_s10] sm:$0x3] %vm2103_vm3, %v2100_v27  ;;  %2364 = vst.msk [vmem:[%s3172_s10 + $0x2] sm:$0x3] %vm2103_vm3, %v2111_v28 }
 0x329 PF: > { %s3184_s16 = sld [smem:[#allocation5_spill]] }
 0x32f   : > { %s27_s18 = sadd.s32 1, %s3184_s16  }
 0x330   : > { %p24_p4 = scmp.ge.s32.totalorder %s27_s18, 6  }
 0x332   :  { %26 = sbr.rel (!%p24_p4) target bundleno = 17 (0x11), region = 116 }

// kernel: mlppvcnn_forward.3
= control target key start
LH: loop header
LB: loop body
LE: loop exit
PB: predicated region body
PF: predicated region fallthrough
CT: control target
= control target key end

     0   :  { %s1640_s0 = inlined_call_operand.vmem [shape: s32[4], index: 0, kind: input, shape index: {}]   ;;  %s1641_s1 = inlined_call_operand.vmem [shape: bf16[512,256], index: 1, kind: input, shape index: {}]   ;;  %s1642_s2 = inlined_call_operand.vmem [shape: bf16[2,256,256], index: 2, kind: input, shape index: {}]   ;;  %s1643_s3 = inlined_call_operand.vmem [shape: f32[2,1,256], index: 3, kind: input, shape index: {}]   ;;  %s1644_s4 = inlined_call_operand.vmem [shape: bf16[2,256,128], index: 4, kind: input, shape index: {}]   ;;  %s1645_s5 = inlined_call_operand.vmem [shape: f32[2,1,128], index: 5, kind: input, shape index: {}]   ;;  %s1646_s6 = inlined_call_operand.vmem [shape: f32[512,128], index: 6, kind: output, shape index: {}]  }
   0x1   :  { %s11_s23 = sshll.u32 %s1640_s0, 4  ;;  %s12_s23 = int_to_ptr.vmem [resolvable:$true] %s11_s23 }
   0x2   :  { %s1394_s24 = scalar_lea.vmem %s12_s23, 16  ;;  %p1399_p1 = scmp.lt.s32.totalorder %s12_s23, %s12_s23 }
   0x3   :  { %p1395_p0 = scmp.ne.s32.totalorder %s12_s23, %s1394_s24  ;;  %p1400_p2 = scmp.lt.s32.totalorder %s1394_s24, %s1394_s24 }
   0x5   :  { %p1401_p3 = por %p1400_p2, %p1399_p1 }
   0x7   :  { %p1402_p4 = pnand %p1401_p3, %p1395_p0 }
   0x9   :  { %1405 = shalt.err (!%p1402_p4)  }
   0xa   :  { %s1416_s25 = smov [#allocation3]  }
   0xb   :  { %14 = dma.vmem_to_smem %s12_s23, 16, %s1416_s25, [#allocation2] }
   0xc   :  { %1410 = dma.done.wait [#allocation2], 16 }
   0xd   :  { %1411 = vsyncadd [#allocation2], 4294967280 }
   0xe   :  { %16 = sfence }
   0xf   :  { %s1455_s26 = smov 0  }
  0x10 LB: > { %s1461_s0 = sadd.s32 4294967295, %s1414_s26   ;;  %p1152_p5 = scmp.ge.s32.totalorder %s1414_s26, 1  ;;  %s1414_s26 = sphi %s1455_s26, %s22_s26  }
  0x11   : > { %p249_p6 = scmp.lt.s32.totalorder %s1414_s26, 5 }
  0x13   : > { %p250_p7 = pnand %p1152_p5, %p249_p6 }
  0x14   : > { %s306_s27 = sld [smem:[#allocation3 + %s1461_s0]] (!%p250_p7)  ;;  %s1153_s28 = sshll.u32 (!%p250_p7), %s1461_s0, 4 }
  0x15   : > { %253 = sbr.rel (%p250_p7) target bundleno = 595 (0x253), region = 40  ;;  %p300_p8 = scmp.lt.s32.totalorder (!%p250_p7), %s1153_s28, 63 }
  0x16   : > { %s319_s13 = sld [smem:[#allocation3 + %s1461_s0]] (!%p250_p7) }
  0x17   : > { %s313_s18 = sld [smem:[#allocation3 + %s1461_s0]] (!%p250_p7) }
  0x18   : > { %s326_s23 = sld [smem:[#allocation3 + %s1461_s0]] (!%p250_p7) }
  0x1a   : > { %p307_p9 = scmp.lt.s32.totalorder (!%p250_p7), %s306_s27, 1 }
  0x1c   : > { %s1648_s28 = smov (!%p300_p8, %s1153_s28), 63  ;;  %s1650_s27 = smov (!%p307_p9, %s306_s27), 1 }
  0x1d   : > { %s1230_s29 = sshll.u32 %s1648_s28, 3  ;;  %s1231_s9 = sshll.u32 %s1650_s27, 8 }
  0x1e   : > { %s1475_s8 = scalar_lea.vmem %s1641_s1, %s1230_s29  ;;  %s1481_s12 = scalar_lea.vmem %s1642_s2, %s1231_s9 }
  0x1f   : > { %v1356_v0 = vld [vmem:[%s1475_s8 + $0x4] ss:$8 sps:$4 sm:$0xff]   ;;  %v1308_v2 = vld [vmem:[%s1481_s12] ss:$8 sps:$4 sm:$0xff]   ;;  %v1309_v3 = vld [vmem:[%s1481_s12 + $0x14] ss:$8 sps:$4 sm:$0xff]  }
  0x20   : > { %670 = vmatprep.mubr.bf16.mxu0 %v1356_v0  ;;  %v1306_v1 = vld [vmem:[%s1481_s12 + $0x4] ss:$8 sps:$4 sm:$0xff]   ;;  %v1311_v4 = vld [vmem:[%s1481_s12 + $0x10] ss:$8 sps:$4 sm:$0xff]   ;;  %v1314_v6 = vld [vmem:[%s1481_s12 + $0x20] ss:$8 sps:$4 sm:$0xff]   ;;  %v388_v0 = vlaneseq }
  0x21   : > { %638 = vmatprep.subr.bf16.mxu0 %v1306_v1  ;;  %v1312_v5 = vld [vmem:[%s1481_s12 + $0x24] ss:$8 sps:$4 sm:$0xff]   ;;  %v1315_v7 = vld [vmem:[%s1481_s12 + $0x34] ss:$8 sps:$4 sm:$0xff]   ;;  %v1317_v8 = vld [vmem:[%s1481_s12 + $0x30] ss:$8 sps:$4 sm:$0xff]  }
  0x22   : > { %639 = vmatpush1.bf16.msra.mxu0 %v1308_v2  ;;  %v1318_v9 = vld [vmem:[%s1481_s12 + $0x44] ss:$8 sps:$4 sm:$0xff]   ;;  %p320_p10 = scmp.lt.s32.totalorder %s319_s13, 1  ;;  %v1320_v10 = vld [vmem:[%s1481_s12 + $0x40] ss:$8 sps:$4 sm:$0xff]   ;;  %p314_p11 = scmp.lt.s32.totalorder %s313_s18, 1 }
  0x23   : > { %640 = vmatprep.subr.bf16.mxu0 %v1309_v3  ;;  %v1321_v11 = vld [vmem:[%s1481_s12 + $0x54] ss:$8 sps:$4 sm:$0xff]   ;;  %v1323_v12 = vld [vmem:[%s1481_s12 + $0x50] ss:$8 sps:$4 sm:$0xff]   ;;  %v1324_v13 = vld [vmem:[%s1481_s12 + $0x64] ss:$8 sps:$4 sm:$0xff]  }
  0x24   : > { %s1652_s13 = smov (!%p320_p10, %s319_s13), 1  ;;  %v1326_v14 = vld [vmem:[%s1481_s12 + $0x60] ss:$8 sps:$4 sm:$0xff]   ;;  %v1327_v15 = vld [vmem:[%s1481_s12 + $0x74] ss:$8 sps:$4 sm:$0xff]   ;;  %s1654_s18 = smov (!%p314_p11, %s313_s18), 1 }
  0x25   : > { %s1232_s14 = sshll.u32 %s1652_s13, 7  ;;  %v1329_v16 = vld [vmem:[%s1481_s12 + $0x70] ss:$8 sps:$4 sm:$0xff]   ;;  %v1330_v17 = vld [vmem:[%s1481_s12 + $0x84] ss:$8 sps:$4 sm:$0xff]   ;;  %s1158_s19 = sshll.u32 %s1654_s18, 1 }
  0x26   : > { %641 = vmatpush1.bf16.msra.mxu0 %v1311_v4  ;;  %s1502_s17 = scalar_lea.vmem %s1644_s4, %s1232_s14  ;;  %v1332_v20 = vld [vmem:[%s1481_s12 + $0x80] ss:$8 sps:$4 sm:$0xff]   ;;  %v1333_v24 = vld [vmem:[%s1481_s12 + $0x94] ss:$8 sps:$4 sm:$0xff]   ;;  %v1335_v25 = vld [vmem:[%s1481_s12 + $0x90] ss:$8 sps:$4 sm:$0xff]   ;;  %s317_s22 = scalar_lea.vmem %s1643_s3, %s1158_s19 }
  0x27   : > { %642 = vmatprep.subr.bf16.mxu0 %v1312_v5  ;;  %v1378_v18 = vld [vmem:[%s1502_s17 + $0x40] sm:$0xff]   ;;  %v1380_v21 = vld [vmem:[%s1502_s17 + $0x48] sm:$0xff]   ;;  %v1382_v23 = vld [vmem:[%s1502_s17 + $0x50] sm:$0xff]   ;;  %v389_v1 = vshrl.u32 %v388_v0, 7  ;;  %p327_p12 = scmp.lt.s32.totalorder %s326_s23, 1 }
  0x28   : > { %v1379_v19 = vld [vmem:[%s1502_s17] sm:$0xff]   ;;  %1233 = vmatprep.subr.bf16.mxu1 %v1378_v18  ;;  %v1381_v22 = vld [vmem:[%s1502_s17 + $0x8] sm:$0xff]   ;;  %v1383_v26 = vld [vmem:[%s1502_s17 + $0x10] sm:$0xff]  }
  0x29   : > { %1234 = vmatpush3.bf16.msra.mxu1 %v1379_v19  ;;  %v1384_v27 = vld [vmem:[%s1502_s17 + $0x58] sm:$0xff]   ;;  %v1336_v28 = vld [vmem:[%s1481_s12 + $0xa4] ss:$8 sps:$4 sm:$0xff]   ;;  %v1338_v29 = vld [vmem:[%s1481_s12 + $0xa0] ss:$8 sps:$4 sm:$0xff]   ;;  %v390_v2 = vsub.s32 0, %v389_v1 }
  0x2a   : > { %643 = vmatpush1.bf16.msra.mxu0 %v1314_v6  ;;  %1235 = vmatprep.subr.bf16.mxu1 %v1380_v21  ;;  %v1385_v30 = vld [vmem:[%s1502_s17 + $0x18] sm:$0xff]   ;;  %v1386_v32 = vld [vmem:[%s1502_s17 + $0x60] sm:$0xff]   ;;  %v1388_v35 = vld [vmem:[%s1502_s17 + $0x68] sm:$0xff]   ;;  %v394_v4 = vsub.s32 1, %v389_v1  ;;  %s1656_s23 = smov (!%p327_p12, %s326_s23), 1 }
  0x2b   : > { %644 = vmatprep.subr.bf16.mxu0 %v1315_v7  ;;  %v1339_v31 = vld [vmem:[%s1481_s12 + $0xb4] ss:$8 sps:$4 sm:$0xff]   ;;  %v1387_v33 = vld [vmem:[%s1502_s17 + $0x20] sm:$0xff]   ;;  %v1341_v34 = vld [vmem:[%s1481_s12 + $0xb0] ss:$8 sps:$4 sm:$0xff]   ;;  %s329_s27 = scalar_lea.vmem %s1645_s5, %s1656_s23 }
  0x2c   : > { %v1342_v36 = vld [vmem:[%s1481_s12 + $0xc4] ss:$8 sps:$4 sm:$0xff]   ;;  %v1344_v37 = vld [vmem:[%s1481_s12 + $0xc0] ss:$8 sps:$4 sm:$0xff]   ;;  %v1345_v38 = vld [vmem:[%s1481_s12 + $0xd4] ss:$8 sps:$4 sm:$0xff]  }
  0x2d   : > { %1236 = vmatpush3.bf16.msra.mxu1 %v1381_v22  ;;  %v1347_v39 = vld [vmem:[%s1481_s12 + $0xd0] ss:$8 sps:$4 sm:$0xff]   ;;  %v1348_v40 = vld [vmem:[%s1481_s12 + $0xe4] ss:$8 sps:$4 sm:$0xff]   ;;  %v1350_v41 = vld [vmem:[%s1481_s12 + $0xe0] ss:$8 sps:$4 sm:$0xff]  }
  0x2e   : > { %645 = vmatpush1.bf16.msra.mxu0 %v1317_v8  ;;  %1237 = vmatprep.subr.bf16.mxu1 %v1382_v23  ;;  %v1351_v42 = vld [vmem:[%s1481_s12 + $0xf4] ss:$8 sps:$4 sm:$0xff]   ;;  %v1353_v43 = vld [vmem:[%s1481_s12 + $0xf0] ss:$8 sps:$4 sm:$0xff]   ;;  %v1354_v44 = vld [vmem:[%s1475_s8] ss:$8 sps:$4 sm:$0xff]  }
  0x2f   : > { %646 = vmatprep.subr.bf16.mxu0 %v1318_v9  ;;  %v1357_v45 = vld [vmem:[%s1475_s8 + $0x14] ss:$8 sps:$4 sm:$0xff]   ;;  %v1359_v46 = vld [vmem:[%s1475_s8 + $0x10] ss:$8 sps:$4 sm:$0xff]   ;;  %v1360_v47 = vld [vmem:[%s1475_s8 + $0x24] ss:$8 sps:$4 sm:$0xff]  }
  0x30   : > { %v1362_v48 = vld [vmem:[%s1475_s8 + $0x20] ss:$8 sps:$4 sm:$0xff]   ;;  %v1363_v49 = vld [vmem:[%s1475_s8 + $0x34] ss:$8 sps:$4 sm:$0xff]   ;;  %v1365_v50 = vld [vmem:[%s1475_s8 + $0x30] ss:$8 sps:$4 sm:$0xff]  }
  0x31   : > { %1238 = vmatpush3.bf16.msra.mxu1 %v1383_v26  ;;  %v1366_v51 = vld [vmem:[%s1475_s8 + $0x44] ss:$8 sps:$4 sm:$0xff]   ;;  %v1368_v52 = vld [vmem:[%s1475_s8 + $0x40] ss:$8 sps:$4 sm:$0xff]   ;;  %v1369_v53 = vld [vmem:[%s1475_s8 + $0x54] ss:$8 sps:$4 sm:$0xff]  }
  0x32   : > { %647 = vmatpush1.bf16.msra.mxu0 %v1320_v10  ;;  %1239 = vmatprep.subr.bf16.mxu1 %v1384_v27  ;;  %v1371_v54 = vld [vmem:[%s1475_s8 + $0x50] ss:$8 sps:$4 sm:$0xff]   ;;  %v1372_v55 = vld [vmem:[%s1475_s8 + $0x64] ss:$8 sps:$4 sm:$0xff]   ;;  %v1374_v56 = vld [vmem:[%s1475_s8 + $0x60] ss:$8 sps:$4 sm:$0xff]  }
  0x33   : > { %648 = vmatprep.subr.bf16.mxu0 %v1321_v11  ;;  %v1375_v57 = vld [vmem:[%s1475_s8 + $0x74] ss:$8 sps:$4 sm:$0xff]   ;;  %v1377_v58 = vld [vmem:[%s1475_s8 + $0x70] ss:$8 sps:$4 sm:$0xff]   ;;  %v1389_v59 = vld [vmem:[%s1502_s17 + $0x28] sm:$0xff]   ;;  %s1603_s8 = scalar_lea.vmem %s1646_s6, %s1230_s29 }
  0x34   : > { %v1390_v60 = vld [vmem:[%s1502_s17 + $0x70] sm:$0xff]   ;;  %v1392_v62 = vld [vmem:[%s1502_s17 + $0x78] sm:$0xff]   ;;  %v386_v3 = vld [vmem:[%s317_s22] sm:$0x3] }
  0x35   : > { %1240 = vmatpush3.bf16.msra.mxu1 %v1385_v30  ;;  %v1391_v61 = vld [vmem:[%s1502_s17 + $0x30] sm:$0xff]   ;;  %v1393_v63 = vld [vmem:[%s1502_s17 + $0x38] sm:$0xff]   ;;  %v1556_v5 = vrot.slane %v386_v3, %v390_v2  ;;  %v1558_v6 = vrot.slane %v386_v3, %v394_v4 }
  0x36   : > { %649 = vmatpush1.bf16.msra.mxu0 %v1323_v12  ;;  %1241 = vmatprep.subr.bf16.mxu1 %v1386_v32 }
  0x37   : > { %650 = vmatprep.subr.bf16.mxu0 %v1324_v13 }
  0x39   : > { %1242 = vmatpush3.bf16.msra.mxu1 %v1387_v33 }
  0x3a   : > { %651 = vmatpush1.bf16.msra.mxu0 %v1326_v14  ;;  %1243 = vmatprep.subr.bf16.mxu1 %v1388_v35 }
  0x3b   : > { %652 = vmatprep.subr.bf16.mxu0 %v1327_v15 }
  0x3d   : > { %1244 = vmatpush3.bf16.msra.mxu1 %v1389_v59 }
  0x3e   : > { %653 = vmatpush1.bf16.msra.mxu0 %v1329_v16  ;;  %1245 = vmatprep.subr.bf16.mxu1 %v1390_v60 }
  0x3f   : > { %654 = vmatprep.subr.bf16.mxu0 %v1330_v17 }
  0x41   : > { %1246 = vmatpush3.bf16.msra.mxu1 %v1391_v61 }
  0x42   : > { %655 = vmatpush1.bf16.msra.mxu0 %v1332_v20  ;;  %1247 = vmatprep.subr.bf16.mxu1 %v1392_v62 }
  0x43   : > { %656 = vmatprep.subr.bf16.mxu0 %v1333_v24 }
  0x45   : > { %1248 = vmatpush3.bf16.msra.mxu1 %v1393_v63 }
  0x46   : > { %657 = vmatpush1.bf16.msra.mxu0 %v1335_v25 }
  0x47   : > { %658 = vmatprep.subr.bf16.mxu0 %v1336_v28 }
  0x4a   : > { %659 = vmatpush1.bf16.msra.mxu0 %v1338_v29 }
  0x4b   : > { %660 = vmatprep.subr.bf16.mxu0 %v1339_v31 }
  0x4e   : > { %661 = vmatpush1.bf16.msra.mxu0 %v1341_v34 }
  0x4f   : > { %662 = vmatprep.subr.bf16.mxu0 %v1342_v36 }
  0x52   : > { %663 = vmatpush1.bf16.msra.mxu0 %v1344_v37 }
  0x53   : > { %664 = vmatprep.subr.bf16.mxu0 %v1345_v38 }
  0x56   : > { %665 = vmatpush1.bf16.msra.mxu0 %v1347_v39 }
  0x57   : > { %666 = vmatprep.subr.bf16.mxu0 %v1348_v40 }
  0x5a   : > { %667 = vmatpush1.bf16.msra.mxu0 %v1350_v41 }
  0x5b   : > { %668 = vmatprep.subr.bf16.mxu0 %v1351_v42 }
  0x5e   : > { %669 = vmatpush1.bf16.msra.mxu0 %v1353_v43 }
  0x61   : > { %671 = vmatmul.mubr.bf16.vlgmr.msra.gmra.mrb[0].mxu0 %v1354_v44 }
  0x62   : > { %680 = vmatprep.mubr.bf16.mxu0 %v1357_v45 }
  0x69   : > { %681 = vmatmul.mubr.bf16.gmra.mrb[4].mxu0 %v1359_v46 }
  0x6a   : > { %690 = vmatprep.mubr.bf16.mxu0 %v1360_v47 }
  0x71   : > { %691 = vmatmul.mubr.bf16.gmra.mrb[8].mxu0 %v1362_v48 }
  0x72   : > { %700 = vmatprep.mubr.bf16.mxu0 %v1363_v49 }
  0x79   : > { %701 = vmatmul.mubr.bf16.gmra.mrb[12].mxu0 %v1365_v50 }
  0x7a   : > { %710 = vmatprep.mubr.bf16.mxu0 %v1366_v51 }
  0x81   : > { %711 = vmatmul.mubr.bf16.gmra.mrb[16].mxu0 %v1368_v52 }
  0x82   : > { %720 = vmatprep.mubr.bf16.mxu0 %v1369_v53 }
  0x89   : > { %721 = vmatmul.mubr.bf16.gmra.mrb[20].mxu0 %v1371_v54 }
  0x8a   : > { %730 = vmatprep.mubr.bf16.mxu0 %v1372_v55 }
  0x91   : > { %731 = vmatmul.mubr.bf16.gmra.mrb[24].mxu0 %v1374_v56 }
  0x92   : > { %740 = vmatprep.mubr.bf16.mxu0 %v1375_v57 }
  0x99   : > { %741 = vmatmul.mubr.bf16.gmra.mrb[28].mxu0 %v1377_v58 }
 0x134   : > { %v672_v7 = vpop.f32.mrb[0].mxu0 }
 0x135   : > { %v673_v8 = vadd.f32 %v672_v7, %v1556_v5  ;;  %v674_v9 = vpop.f32.mrb[1].mxu0 }
 0x136   : > { %v675_v10 = vadd.f32 %v674_v9, %v1558_v6  ;;  %v676_v11 = vpop.f32.mrb[2].mxu0 }
 0x137   : > { %v677_v12 = vadd.f32 %v676_v11, %v1556_v5  ;;  %v678_v13 = vpop.f32.mrb[3].mxu0  ;;  %v751_v15 = vmax.f32 %v673_v8, 0.0 }
 0x138   : > { %v679_v14 = vadd.f32 %v678_v13, %v1558_v6  ;;  %v752_v17 = vmax.f32 %v675_v10, 0.0 }
 0x139   : > { %v753_v16 = vmax.f32 %v677_v12, 0.0 }
 0x13a   : > { %v754_v18 = vmax.f32 %v679_v14, 0.0 }
 0x13b   : > { %v783_v19 = vpack.c.bf16 %v753_v16, %v751_v15 }
 0x13c   : > { %v682_v20 = vpop.f32.mrb[4].mxu0  ;;  %v784_v21 = vpack.c.bf16 %v754_v18, %v752_v17 }
 0x13d   : > { %v683_v22 = vadd.f32 %v682_v20, %v1556_v5  ;;  %v684_v23 = vpop.f32.mrb[5].mxu0 }
 0x13e   : > { %v685_v24 = vadd.f32 %v684_v23, %v1558_v6  ;;  %v686_v25 = vpop.f32.mrb[6].mxu0  ;;  %966 = vmatprep.mubr.bf16.mxu1 %v784_v21 }
 0x13f   : > { %v687_v26 = vadd.f32 %v686_v25, %v1556_v5  ;;  %v688_v27 = vpop.f32.mrb[7].mxu0  ;;  %967 = vmatmul.mubr.bf16.vlgmr.msra.gmra.mrb[0].mxu1 %v783_v19  ;;  %v755_v29 = vmax.f32 %v683_v22, 0.0 }
 0x140   : > { %v689_v28 = vadd.f32 %v688_v27, %v1558_v6  ;;  %v756_v31 = vmax.f32 %v685_v24, 0.0 }
 0x141   : > { %v757_v30 = vmax.f32 %v687_v26, 0.0 }
 0x142   : > { %v758_v32 = vmax.f32 %v689_v28, 0.0 }
 0x143   : > { %v785_v33 = vpack.c.bf16 %v757_v30, %v755_v29 }
 0x144   : > { %v786_v34 = vpack.c.bf16 %v758_v32, %v756_v31  ;;  %v692_v35 = vpop.f32.mrb[8].mxu0 }
 0x145   : > { %v693_v36 = vadd.f32 %v692_v35, %v1556_v5  ;;  %v694_v37 = vpop.f32.mrb[9].mxu0 }
 0x146   : > { %v695_v38 = vadd.f32 %v694_v37, %v1558_v6  ;;  %v696_v39 = vpop.f32.mrb[10].mxu0  ;;  %974 = vmatprep.mubr.bf16.mxu1 %v786_v34 }
 0x147   : > { %v697_v40 = vadd.f32 %v696_v39, %v1556_v5  ;;  %v698_v41 = vpop.f32.mrb[11].mxu0  ;;  %975 = vmatmul.mubr.bf16.gmra.mrb[4].mxu1 %v785_v33  ;;  %v759_v43 = vmax.f32 %v693_v36, 0.0 }
 0x148   : > { %v699_v42 = vadd.f32 %v698_v41, %v1558_v6  ;;  %v760_v45 = vmax.f32 %v695_v38, 0.0 }
 0x149   : > { %v761_v44 = vmax.f32 %v697_v40, 0.0 }
 0x14a   : > { %v762_v46 = vmax.f32 %v699_v42, 0.0 }
 0x14b   : > { %v787_v47 = vpack.c.bf16 %v761_v44, %v759_v43 }
 0x14c   : > { %v788_v48 = vpack.c.bf16 %v762_v46, %v760_v45  ;;  %v702_v49 = vpop.f32.mrb[12].mxu0 }
 0x14d   : > { %v703_v50 = vadd.f32 %v702_v49, %v1556_v5  ;;  %v704_v51 = vpop.f32.mrb[13].mxu0 }
 0x14e   : > { %v705_v52 = vadd.f32 %v704_v51, %v1558_v6  ;;  %v706_v53 = vpop.f32.mrb[14].mxu0  ;;  %982 = vmatprep.mubr.bf16.mxu1 %v788_v48 }
 0x14f   : > { %v707_v54 = vadd.f32 %v706_v53, %v1556_v5  ;;  %v708_v55 = vpop.f32.mrb[15].mxu0  ;;  %983 = vmatmul.mubr.bf16.gmra.mrb[8].mxu1 %v787_v47  ;;  %v763_v57 = vmax.f32 %v703_v50, 0.0 }
 0x150   : > { %v709_v56 = vadd.f32 %v708_v55, %v1558_v6  ;;  %v764_v59 = vmax.f32 %v705_v52, 0.0 }
 0x151   : > { %v765_v58 = vmax.f32 %v707_v54, 0.0 }
 0x152   : > { %v766_v60 = vmax.f32 %v709_v56, 0.0 }
 0x153   : > { %v789_v61 = vpack.c.bf16 %v765_v58, %v763_v57  ;;  %v1596_v57 = vld [vmem:[%s329_s27] ss:$0 sm:$0xff] }
 0x154   : > { %v790_v62 = vpack.c.bf16 %v766_v60, %v764_v59  ;;  %v712_v63 = vpop.f32.mrb[16].mxu0 }
 0x155   : > { %v713_v0 = vadd.f32 %v712_v63, %v1556_v5  ;;  %v714_v1 = vpop.f32.mrb[17].mxu0 }
 0x156   : > { %v715_v2 = vadd.f32 %v714_v1, %v1558_v6  ;;  %v716_v3 = vpop.f32.mrb[18].mxu0  ;;  %990 = vmatprep.mubr.bf16.mxu1 %v790_v62 }
 0x157   : > { %v717_v4 = vadd.f32 %v716_v3, %v1556_v5  ;;  %v718_v7 = vpop.f32.mrb[19].mxu0  ;;  %991 = vmatmul.mubr.bf16.gmra.mrb[12].mxu1 %v789_v61  ;;  %v767_v9 = vmax.f32 %v713_v0, 0.0 }
 0x158   : > { %v719_v8 = vadd.f32 %v718_v7, %v1558_v6  ;;  %v768_v11 = vmax.f32 %v715_v2, 0.0 }
 0x159   : > { %v769_v10 = vmax.f32 %v717_v4, 0.0 }
 0x15a   : > { %v770_v12 = vmax.f32 %v719_v8, 0.0 }
 0x15b   : > { %v791_v13 = vpack.c.bf16 %v769_v10, %v767_v9 }
 0x15c   : > { %v792_v14 = vpack.c.bf16 %v770_v12, %v768_v11  ;;  %v722_v15 = vpop.f32.mrb[20].mxu0 }
 0x15d   : > { %v723_v16 = vadd.f32 %v722_v15, %v1556_v5  ;;  %v724_v17 = vpop.f32.mrb[21].mxu0 }
 0x15e   : > { %v725_v18 = vadd.f32 %v724_v17, %v1558_v6  ;;  %v726_v19 = vpop.f32.mrb[22].mxu0  ;;  %998 = vmatprep.mubr.bf16.mxu1 %v792_v14 }
 0x15f   : > { %v727_v20 = vadd.f32 %v726_v19, %v1556_v5  ;;  %v728_v21 = vpop.f32.mrb[23].mxu0  ;;  %999 = vmatmul.mubr.bf16.gmra.mrb[16].mxu1 %v791_v13  ;;  %v771_v23 = vmax.f32 %v723_v16, 0.0 }
 0x160   : > { %v729_v22 = vadd.f32 %v728_v21, %v1558_v6  ;;  %v772_v25 = vmax.f32 %v725_v18, 0.0 }
 0x161   : > { %v773_v24 = vmax.f32 %v727_v20, 0.0 }
 0x162   : > { %v774_v26 = vmax.f32 %v729_v22, 0.0 }
 0x163   : > { %v793_v27 = vpack.c.bf16 %v773_v24, %v771_v23 }
 0x164   : > { %v794_v28 = vpack.c.bf16 %v774_v26, %v772_v25  ;;  %v732_v29 = vpop.f32.mrb[24].mxu0 }
 0x165   : > { %v733_v30 = vadd.f32 %v732_v29, %v1556_v5  ;;  %v734_v31 = vpop.f32.mrb[25].mxu0 }
 0x166   : > { %v735_v32 = vadd.f32 %v734_v31, %v1558_v6  ;;  %v736_v33 = vpop.f32.mrb[26].mxu0  ;;  %1006 = vmatprep.mubr.bf16.mxu1 %v794_v28 }
 0x167   : > { %v737_v34 = vadd.f32 %v736_v33, %v1556_v5  ;;  %v738_v35 = vpop.f32.mrb[27].mxu0  ;;  %1007 = vmatmul.mubr.bf16.gmra.mrb[20].mxu1 %v793_v27  ;;  %v775_v37 = vmax.f32 %v733_v30, 0.0 }
 0x168   : > { %v739_v36 = vadd.f32 %v738_v35, %v1558_v6  ;;  %v776_v39 = vmax.f32 %v735_v32, 0.0 }
 0x169   : > { %v777_v38 = vmax.f32 %v737_v34, 0.0 }
 0x16a   : > { %v778_v40 = vmax.f32 %v739_v36, 0.0 }
 0x16b   : > { %v795_v41 = vpack.c.bf16 %v777_v38, %v775_v37 }
 0x16c   : > { %v796_v42 = vpack.c.bf16 %v778_v40, %v776_v39  ;;  %v742_v43 = vpop.f32.mrb[28].mxu0 }
 0x16d   : > { %v743_v44 = vadd.f32 %v742_v43, %v1556_v5  ;;  %v744_v45 = vpop.f32.mrb[29].mxu0 }
 0x16e   : > { %v745_v46 = vadd.f32 %v744_v45, %v1558_v6  ;;  %v746_v47 = vpop.f32.mrb[30].mxu0  ;;  %1014 = vmatprep.mubr.bf16.mxu1 %v796_v42 }
 0x16f   : > { %v747_v48 = vadd.f32 %v746_v47, %v1556_v5  ;;  %v748_v49 = vpop.f32.mrb[31].mxu0  ;;  %1015 = vmatmul.mubr.bf16.gmra.mrb[24].mxu1 %v795_v41  ;;  %v779_v51 = vmax.f32 %v743_v44, 0.0 }
 0x170   : > { %v749_v50 = vadd.f32 %v748_v49, %v1558_v6  ;;  %v780_v53 = vmax.f32 %v745_v46, 0.0 }
 0x171   : > { %v781_v52 = vmax.f32 %v747_v48, 0.0 }
 0x172   : > { %v782_v54 = vmax.f32 %v749_v50, 0.0 }
 0x173   : > { %v797_v55 = vpack.c.bf16 %v781_v52, %v779_v51 }
 0x174   : > { %v798_v56 = vpack.c.bf16 %v782_v54, %v780_v53 }
 0x176   : > { %1022 = vmatprep.mubr.bf16.mxu1 %v798_v56 }
 0x177   : > { %1023 = vmatmul.mubr.bf16.gmra.mrb[28].mxu1 %v797_v55 }
 0x212   : > { %v1249_v5 = vpop.f32.mrb[0].mxu1 }
 0x213   : > { %v1250_v6 = vpop.f32.mrb[1].mxu1 }
 0x214   : > { %v1251_v58 = vadd.f32 %v1250_v6, %v1249_v5  ;;  %v1252_v59 = vpop.f32.mrb[2].mxu1 }
 0x215   : > { %v1253_v60 = vpop.f32.mrb[3].mxu1 }
 0x216   : > { %v969_v61 = vadd.f32 %v1251_v58, %v1596_v57  ;;  %v1254_v62 = vadd.f32 %v1253_v60, %v1252_v59 }
 0x218   : > { %1031 = vst [vmem:[%s1603_s8] sm:$0xff] %v969_v61  ;;  %v972_v63 = vadd.f32 %v1254_v62, %v1596_v57 }
 0x21a   : > { %1032 = vst [vmem:[%s1603_s8 + $0x8] sm:$0xff] %v972_v63  ;;  %v1255_v0 = vpop.f32.mrb[4].mxu1 }
 0x21b   : > { %v1256_v1 = vpop.f32.mrb[5].mxu1 }
 0x21c   : > { %v1257_v2 = vadd.f32 %v1256_v1, %v1255_v0  ;;  %v1258_v3 = vpop.f32.mrb[6].mxu1 }
 0x21d   : > { %v1259_v4 = vpop.f32.mrb[7].mxu1 }
 0x21e   : > { %v977_v7 = vadd.f32 %v1257_v2, %v1596_v57  ;;  %v1260_v8 = vadd.f32 %v1259_v4, %v1258_v3 }
 0x220   : > { %1033 = vst [vmem:[%s1603_s8 + $0x10] sm:$0xff] %v977_v7  ;;  %v980_v9 = vadd.f32 %v1260_v8, %v1596_v57 }
 0x222   : > { %1034 = vst [vmem:[%s1603_s8 + $0x18] sm:$0xff] %v980_v9  ;;  %v1261_v10 = vpop.f32.mrb[8].mxu1 }
 0x223   : > { %v1262_v11 = vpop.f32.mrb[9].mxu1 }
 0x224   : > { %v1263_v12 = vadd.f32 %v1262_v11, %v1261_v10  ;;  %v1264_v13 = vpop.f32.mrb[10].mxu1 }
 0x225   : > { %v1265_v14 = vpop.f32.mrb[11].mxu1 }
 0x226   : > { %v985_v15 = vadd.f32 %v1263_v12, %v1596_v57  ;;  %v1266_v16 = vadd.f32 %v1265_v14, %v1264_v13 }
 0x228   : > { %1035 = vst [vmem:[%s1603_s8 + $0x20] sm:$0xff] %v985_v15  ;;  %v988_v17 = vadd.f32 %v1266_v16, %v1596_v57 }
 0x22a   : > { %1036 = vst [vmem:[%s1603_s8 + $0x28] sm:$0xff] %v988_v17  ;;  %v1267_v18 = vpop.f32.mrb[12].mxu1 }
 0x22b   : > { %v1268_v19 = vpop.f32.mrb[13].mxu1 }
 0x22c   : > { %v1269_v20 = vadd.f32 %v1268_v19, %v1267_v18  ;;  %v1270_v21 = vpop.f32.mrb[14].mxu1 }
 0x22d   : > { %v1271_v22 = vpop.f32.mrb[15].mxu1 }
 0x22e   : > { %v993_v23 = vadd.f32 %v1269_v20, %v1596_v57  ;;  %v1272_v24 = vadd.f32 %v1271_v22, %v1270_v21 }
 0x230   : > { %1037 = vst [vmem:[%s1603_s8 + $0x30] sm:$0xff] %v993_v23  ;;  %v996_v25 = vadd.f32 %v1272_v24, %v1596_v57 }
 0x232   : > { %1038 = vst [vmem:[%s1603_s8 + $0x38] sm:$0xff] %v996_v25  ;;  %v1273_v26 = vpop.f32.mrb[16].mxu1 }
 0x233   : > { %v1274_v27 = vpop.f32.mrb[17].mxu1 }
 0x234   : > { %v1275_v28 = vadd.f32 %v1274_v27, %v1273_v26  ;;  %v1276_v29 = vpop.f32.mrb[18].mxu1 }
 0x235   : > { %v1277_v30 = vpop.f32.mrb[19].mxu1 }
 0x236   : > { %v1001_v31 = vadd.f32 %v1275_v28, %v1596_v57  ;;  %v1278_v32 = vadd.f32 %v1277_v30, %v1276_v29 }
 0x238   : > { %1039 = vst [vmem:[%s1603_s8 + $0x40] sm:$0xff] %v1001_v31  ;;  %v1004_v33 = vadd.f32 %v1278_v32, %v1596_v57 }
 0x23a   : > { %1040 = vst [vmem:[%s1603_s8 + $0x48] sm:$0xff] %v1004_v33  ;;  %v1279_v34 = vpop.f32.mrb[20].mxu1 }
 0x23b   : > { %v1280_v35 = vpop.f32.mrb[21].mxu1 }
 0x23c   : > { %v1281_v36 = vadd.f32 %v1280_v35, %v1279_v34  ;;  %v1282_v37 = vpop.f32.mrb[22].mxu1 }
 0x23d   : > { %v1283_v38 = vpop.f32.mrb[23].mxu1 }
 0x23e   : > { %v1009_v39 = vadd.f32 %v1281_v36, %v1596_v57  ;;  %v1284_v40 = vadd.f32 %v1283_v38, %v1282_v37 }
 0x240   : > { %1041 = vst [vmem:[%s1603_s8 + $0x50] sm:$0xff] %v1009_v39  ;;  %v1012_v41 = vadd.f32 %v1284_v40, %v1596_v57 }
 0x242   : > { %1042 = vst [vmem:[%s1603_s8 + $0x58] sm:$0xff] %v1012_v41  ;;  %v1285_v42 = vpop.f32.mrb[24].mxu1 }
 0x243   : > { %v1286_v43 = vpop.f32.mrb[25].mxu1 }
 0x244   : > { %v1287_v44 = vadd.f32 %v1286_v43, %v1285_v42  ;;  %v1288_v45 = vpop.f32.mrb[26].mxu1 }
 0x245   : > { %v1289_v46 = vpop.f32.mrb[27].mxu1 }
 0x246   : > { %v1017_v47 = vadd.f32 %v1287_v44, %v1596_v57  ;;  %v1290_v48 = vadd.f32 %v1289_v46, %v1288_v45 }
 0x248   : > { %1043 = vst [vmem:[%s1603_s8 + $0x60] sm:$0xff] %v1017_v47  ;;  %v1020_v49 = vadd.f32 %v1290_v48, %v1596_v57 }
 0x24a   : > { %1044 = vst [vmem:[%s1603_s8 + $0x68] sm:$0xff] %v1020_v49  ;;  %v1291_v50 = vpop.f32.mrb[28].mxu1 }
 0x24b   : > { %v1292_v51 = vpop.f32.mrb[29].mxu1 }
 0x24c   : > { %v1293_v52 = vadd.f32 %v1292_v51, %v1291_v50  ;;  %v1294_v53 = vpop.f32.mrb[30].mxu1 }
 0x24d   : > { %v1295_v54 = vpop.f32.mrb[31].mxu1 }
 0x24e   : > { %v1025_v55 = vadd.f32 %v1293_v52, %v1596_v57  ;;  %v1296_v56 = vadd.f32 %v1295_v54, %v1294_v53 }
 0x250   : > { %1045 = vst [vmem:[%s1603_s8 + $0x70] sm:$0xff] %v1025_v55  ;;  %v1028_v5 = vadd.f32 %v1296_v56, %v1596_v57 }
 0x252   : > { %1046 = vst [vmem:[%s1603_s8 + $0x78] sm:$0xff] %v1028_v5 }
 0x253 PF: > { %s22_s26 = sadd.s32 1, %s1414_s26  }
 0x254   : > { %p19_p13 = scmp.ge.s32.totalorder %s22_s26, 6  }
 0x256   :  { %21 = sbr.rel (!%p19_p13) target bundleno = 16 (0x10), region = 82 }

</bundles_post_ra>
